<compile_context>
chip_gen: v6e
topology: v6e:2x2x1
jax: 0.10.0
libtpu: 0.0.40
codegen_flags: <defaults>
</compile_context>

<pallas_src>
import functools
import math

import jax
import jax.numpy as jnp
from jax import lax
from jax.experimental import pallas as pl
from jax.experimental.pallas import tpu as pltpu

TRANS_NHEAD = 8
TRANS_DIM_FEEDFWD = 2048


# ---------------------------------------------------------------------------
# helpers
# ---------------------------------------------------------------------------
def _layernorm(x, gamma, beta, eps):
    mu = jnp.mean(x, axis=-1, keepdims=True)
    xc = x - mu
    var = jnp.mean(xc * xc, axis=-1, keepdims=True)
    return xc * lax.rsqrt(var + eps) * gamma + beta


def _seq_tile(L, cap):
    """Largest power-of-two tile <= cap dividing L (multiple of 8), else L."""
    t = math.gcd(L, cap)
    return t if (t % 8 == 0) else L


def _vmem_limit_bytes():
    """Per-generation scoped-VMEM limit (v7x: 64 MiB phys, v5e/v6e: 128 MiB)."""
    try:
        cap = int(pltpu.get_tpu_info().vmem_capacity_bytes)
    except Exception:  # info unavailable -> conservative default
        cap = 64 * 1024 * 1024
    return max(32 * 1024 * 1024, min(cap * 7 // 8, 112 * 1024 * 1024))


@functools.lru_cache(maxsize=None)
def _single_buffer_ok():
    """Probe whether pipeline_mode=pl.Buffered(1) is supported here."""
    def _k(x_ref, o_ref):
        o_ref[...] = x_ref[...] + 1.0
    try:
        spec = pl.BlockSpec((8, 128), lambda i: (0, 0),
                            pipeline_mode=pl.Buffered(1))
        out = pl.pallas_call(
            _k,
            out_shape=jax.ShapeDtypeStruct((8, 128), jnp.float32),
            grid=(2,),
            in_specs=[spec],
            out_specs=pl.BlockSpec((8, 128), lambda i: (0, 0)),
        )(jnp.zeros((8, 128), jnp.float32))
        out = jax.block_until_ready(out)
        return bool(jnp.all(out == 1.0))
    except Exception:
        return False


def _const_spec(shape):
    """BlockSpec for weights whose block index never changes across the grid.

    Single-buffered when supported: they are only DMA'd once, so the second
    pipeline buffer is pure VMEM waste (matters most on v7x's 64 MiB)."""
    idx = lambda *_: (0,) * len(shape)
    if _single_buffer_ok():
        return pl.BlockSpec(shape, idx, pipeline_mode=pl.Buffered(1))
    return pl.BlockSpec(shape, idx)


# ---------------------------------------------------------------------------
# kernel 1: EnResBlock (conv+BN+ReLU+skip) + fused QKV projection
# ---------------------------------------------------------------------------
def _proj_kernel(x_ref, xm1_ref, xp1_ref, wconv_ref, pbias_ref, *rest,
                 D, nhead, has_skip):
    if has_skip:
        skipw_ref, wqkv_ref, tin_ref, q_ref, k_ref, v_ref = rest
    else:
        wqkv_ref, tin_ref, q_ref, k_ref, v_ref = rest

    l = pl.program_id(1)
    n_l = pl.num_programs(1)
    x = x_ref[0]                                    # (tl, C_in) bf16
    tl = x.shape[0]
    hd = D // nhead

    # ---- Conv1d(k=3, pad=1, bias=False) fused with eval-mode BN scale ------
    # wconv = [W0^T | W1^T | W2^T] * bn_scale -> one (tl, C) x (C, 3D) matmul.
    taps = jnp.dot(x, wconv_ref[...], preferred_element_type=jnp.float32)
    y0 = taps[:, 0:D]            # contribution of x[i] to out[i+1]
    y1 = taps[:, D:2 * D]        # contribution of x[i] to out[i]
    y2 = taps[:, 2 * D:3 * D]    # contribution of x[i] to out[i-1]

    # Halo rows from the neighbouring L-tiles (index_map clamps at the ends;
    # scalar predicates zero them at the true sequence boundaries).
    left = jnp.dot(xm1_ref[0, tl - 1:tl, :], wconv_ref[...],
                   preferred_element_type=jnp.float32)[:, 0:D]
    right = jnp.dot(xp1_ref[0, 0:1, :], wconv_ref[...],
                    preferred_element_type=jnp.float32)[:, 2 * D:3 * D]
    left = left * (l > 0).astype(jnp.float32)
    right = right * (l < n_l - 1).astype(jnp.float32)

    row = lax.broadcasted_iota(jnp.int32, (tl, D), 0)
    z0 = jnp.where(row == 0, left, pltpu.roll(y0, shift=1, axis=0))
    z2 = jnp.where(row == tl - 1, right, pltpu.roll(y2, shift=tl - 1, axis=0))
    conv = z0 + y1 + z2 + pbias_ref[0:1, :]          # folded BN bias
    y = jnp.maximum(conv, 0.0)                       # ReLU (dropout = identity)

    if has_skip:
        res = jnp.dot(x, skipw_ref[...], preferred_element_type=jnp.float32)
    else:
        res = x.astype(jnp.float32)
    t_in = y + res                                   # (tl, D) transformer input
    tin_ref[0] = t_in.astype(tin_ref.dtype)

    # ---- fused QKV projection (1/sqrt(hd) folded into Wq / bq) -------------
    qkv = jnp.dot(t_in.astype(jnp.bfloat16), wqkv_ref[...],
                  preferred_element_type=jnp.float32)
    qv = qkv[:, 0:D] + pbias_ref[1:2, :]
    kv = qkv[:, D:2 * D] + pbias_ref[2:3, :]
    vv = qkv[:, 2 * D:3 * D] + pbias_ref[3:4, :]
    for h in range(nhead):                           # head-major bf16 layout
        sl = slice(h * hd, (h + 1) * hd)
        q_ref[0, h] = qv[:, sl].astype(q_ref.dtype)
        k_ref[0, h] = kv[:, sl].astype(k_ref.dtype)
        v_ref[0, h] = vv[:, sl].astype(v_ref.dtype)


def _make_proj_call(B, L, C_in, D, has_skip, nhead=TRANS_NHEAD, tl_cap=256):
    tl = _seq_tile(L, tl_cap)
    n_l = L // tl
    hd = D // nhead
    kern = functools.partial(_proj_kernel, D=D, nhead=nhead, has_skip=has_skip)

    x_spec = pl.BlockSpec((1, tl, C_in), lambda b, l: (b, l, 0))
    xm1_spec = pl.BlockSpec((1, tl, C_in),
                            lambda b, l: (b, jnp.maximum(l - 1, 0), 0))
    xp1_spec = pl.BlockSpec((1, tl, C_in),
                            lambda b, l: (b, jnp.minimum(l + 1, n_l - 1), 0))
    in_specs = [x_spec, xm1_spec, xp1_spec,
                _const_spec((C_in, 3 * D)),          # conv taps (BN folded)
                _const_spec((4, D))]                 # [bn_bias, bq, bk, bv]
    if has_skip:
        in_specs.append(_const_spec((C_in, D)))      # 1x1 skip conv
    in_specs.append(_const_spec((D, 3 * D)))         # fused Wqkv (q-scale folded)

    head_spec = pl.BlockSpec((1, nhead, tl, hd), lambda b, l: (b, 0, l, 0))
    return pl.pallas_call(
        kern,
        out_shape=(jax.ShapeDtypeStruct((B, L, D), jnp.bfloat16),
                   jax.ShapeDtypeStruct((B, nhead, L, hd), jnp.bfloat16),
                   jax.ShapeDtypeStruct((B, nhead, L, hd), jnp.bfloat16),
                   jax.ShapeDtypeStruct((B, nhead, L, hd), jnp.bfloat16)),
        grid=(B, n_l),
        in_specs=in_specs,
        out_specs=(pl.BlockSpec((1, tl, D), lambda b, l: (b, l, 0)),
                   head_spec, head_spec, head_spec),
        compiler_params=pltpu.CompilerParams(
            dimension_semantics=("parallel", "parallel"),
            vmem_limit_bytes=_vmem_limit_bytes()),
    )


# ---------------------------------------------------------------------------
# kernel 2: flash attention (online softmax over key tiles) + FFN + norms
# ---------------------------------------------------------------------------
def _flash_kernel(tin_ref, q_ref, k_ref, v_ref, wo_ref, w1_ref, w2_ref,
                  b1_ref, vec_ref, out_ref, m_sc, l_sc, acc_sc, merge_sc,
                  *, nhead):
    ki = pl.program_id(2)
    n_k = pl.num_programs(2)
    hd = q_ref.shape[-1]

    @pl.when(ki == 0)
    def _init():
        m_sc[...] = jnp.full_like(m_sc, -jnp.inf)
        l_sc[...] = jnp.zeros_like(l_sc)
        acc_sc[...] = jnp.zeros_like(acc_sc)

    q = q_ref[0]                                     # (nhead, tq, hd) bf16, pre-scaled
    k = k_ref[0]                                     # (nhead, tk, hd) bf16
    v = v_ref[0]                                     # (nhead, tk, hd) bf16
    s = jnp.einsum('hqd,hkd->hqk', q, k,
                   preferred_element_type=jnp.float32)          # (nhead, tq, tk)
    m_prev = m_sc[...]
    m_new = jnp.maximum(m_prev, jnp.max(s, axis=-1, keepdims=True))
    alpha = jnp.exp(m_prev - m_new)
    p = jnp.exp(s - m_new)
    l_sc[...] = alpha * l_sc[...] + jnp.sum(p, axis=-1, keepdims=True)
    acc_sc[...] = alpha * acc_sc[...] + jnp.einsum(
        'hqk,hkd->hqd', p.astype(jnp.bfloat16), v,
        preferred_element_type=jnp.float32)
    m_sc[...] = m_new

    @pl.when(ki == n_k - 1)
    def _epilogue():
        inv_l = pl.reciprocal(l_sc[...], approx=True)
        ah = (acc_sc[...] * inv_l).astype(merge_sc.dtype)        # (nhead, tq, hd)
        for h in range(nhead):                                   # merge heads (bf16 slab)
            merge_sc[:, h * hd:(h + 1) * hd] = ah[h]

        vecs = vec_ref[...]                                      # (8, D) f32
        bo, b2 = vecs[0:1, :], vecs[1:2, :]
        ln1_g, ln1_b = vecs[2:3, :], vecs[3:4, :]
        ln2_g, ln2_b = vecs[4:5, :], vecs[5:6, :]
        lno_g, lno_b = vecs[6:7, :], vecs[7:8, :]

        t_in = tin_ref[0].astype(jnp.float32)                    # (tq, D)
        attn = jnp.dot(merge_sc[...], wo_ref[...],
                       preferred_element_type=jnp.float32) + bo
        # TransformerEncoderLayer (post-norm, ReLU FFN, dropout = identity)
        x1 = _layernorm(t_in + attn, ln1_g, ln1_b, 1e-5)
        ff = jnp.dot(x1.astype(jnp.bfloat16), w1_ref[...],
                     preferred_element_type=jnp.float32) + b1_ref[...]
        ff = jnp.maximum(ff, 0.0).astype(jnp.bfloat16)
        ff = jnp.dot(ff, w2_ref[...],
                     preferred_element_type=jnp.float32) + b2
        x2 = _layernorm(x1 + ff, ln2_g, ln2_b, 1e-5)
        # outer EnBiTransformerLayer: x + LayerNorm(x2, eps=1e-6)
        out_ref[0] = (t_in + _layernorm(x2, lno_g, lno_b, 1e-6)
                      ).astype(out_ref.dtype)


def _make_attn_ffn_call(B, L, D, nhead=TRANS_NHEAD, ffn=TRANS_DIM_FEEDFWD,
                        tq_cap=128, tk_cap=128):
    hd = D // nhead
    tq = _seq_tile(L, tq_cap)
    tk = _seq_tile(L, tk_cap)
    n_q, n_k = L // tq, L // tk
    kern = functools.partial(_flash_kernel, nhead=nhead)

    in_specs = [
        pl.BlockSpec((1, tq, D), lambda b, qi, ki: (b, qi, 0)),             # t_in
        pl.BlockSpec((1, nhead, tq, hd), lambda b, qi, ki: (b, 0, qi, 0)),  # q
        pl.BlockSpec((1, nhead, tk, hd), lambda b, qi, ki: (b, 0, ki, 0)),  # k
        pl.BlockSpec((1, nhead, tk, hd), lambda b, qi, ki: (b, 0, ki, 0)),  # v
        _const_spec((D, D)),         # Wo
        _const_spec((D, ffn)),       # W1
        _const_spec((ffn, D)),       # W2
        _const_spec((1, ffn)),       # b1
        _const_spec((8, D)),         # [bo, b2, ln1_g, ln1_b, ln2_g, ln2_b, lno_g, lno_b]
    ]
    return pl.pallas_call(
        kern,
        out_shape=jax.ShapeDtypeStruct((B, L, D), jnp.bfloat16),
        grid=(B, n_q, n_k),
        in_specs=in_specs,
        out_specs=pl.BlockSpec((1, tq, D), lambda b, qi, ki: (b, qi, 0)),
        scratch_shapes=[pltpu.VMEM((nhead, tq, 1), jnp.float32),   # running max
                        pltpu.VMEM((nhead, tq, 1), jnp.float32),   # running sum
                        pltpu.VMEM((nhead, tq, hd), jnp.float32),  # flash acc
                        pltpu.VMEM((tq, D), jnp.bfloat16)],        # head-merge slab
        compiler_params=pltpu.CompilerParams(
            dimension_semantics=("parallel", "parallel", "arbitrary"),
            vmem_limit_bytes=_vmem_limit_bytes()),
    )


# ---------------------------------------------------------------------------
# parameters (synthetic, already in kernel layout with folded scales)
# ---------------------------------------------------------------------------
def init_enssm_params(key, input_size, output_sizes,
                      nhead=TRANS_NHEAD, ffn=TRANS_DIM_FEEDFWD):
    state = [key]

    def nxt():
        state[0], sub = jax.random.split(state[0])
        return sub

    def rnd(shape, s, dtype=jnp.float32):
        return (jax.random.normal(nxt(), shape, jnp.float32) * s).astype(dtype)

    params = []
    in_sz = input_size
    for D in output_sizes:
        assert D % nhead == 0, "d_model must be divisible by nhead"
        hd = D // nhead
        p = {'D': D, 'has_skip': in_sz != D}

        # Conv taps [W0^T | W1^T | W2^T]; eval-mode BN scale folded in.
        wconv = rnd((in_sz, 3 * D), 0.2)
        gamma = 1.0 + rnd((D,), 0.1)
        beta = rnd((D,), 0.05)
        rmean = rnd((D,), 0.05)
        rvar = 1.0 + 0.1 * jnp.abs(rnd((D,), 1.0))
        bn_s = gamma / jnp.sqrt(rvar + 1e-5)
        p['wconv'] = (wconv * jnp.tile(bn_s, 3)[None, :]).astype(jnp.bfloat16)
        bn_bias = beta - rmean * bn_s
        if p['has_skip']:
            p['skipw'] = rnd((in_sz, D), 0.2, jnp.bfloat16)

        # Fused QKV [Wq^T | Wk^T | Wv^T]; 1/sqrt(hd) folded into the q third.
        scale = 1.0 / math.sqrt(hd)
        wq = rnd((D, D), 1.0 / math.sqrt(D)) * scale
        wk = rnd((D, D), 1.0 / math.sqrt(D))
        wv = rnd((D, D), 1.0 / math.sqrt(D))
        p['wqkv'] = jnp.concatenate([wq, wk, wv], axis=1).astype(jnp.bfloat16)
        bq = rnd((D,), 0.02) * scale
        bk = rnd((D,), 0.02)
        bv = rnd((D,), 0.02)
        p['proj_bias'] = jnp.stack([bn_bias, bq, bk, bv], axis=0)   # (4, D)

        p['wo'] = rnd((D, D), 1.0 / math.sqrt(D), jnp.bfloat16)
        p['w1'] = rnd((D, ffn), 1.0 / math.sqrt(D), jnp.bfloat16)
        p['b1'] = rnd((1, ffn), 0.02)
        p['w2'] = rnd((ffn, D), 1.0 / math.sqrt(ffn), jnp.bfloat16)
        bo = rnd((D,), 0.02)
        b2 = rnd((D,), 0.02)
        ln1_g = 1.0 + rnd((D,), 0.05)
        ln1_b = rnd((D,), 0.02)
        ln2_g = 1.0 + rnd((D,), 0.05)
        ln2_b = rnd((D,), 0.02)
        lno_g = 1.0 + rnd((D,), 0.05)
        lno_b = rnd((D,), 0.02)
        p['vecs'] = jnp.stack([bo, b2, ln1_g, ln1_b, ln2_g, ln2_b,
                               lno_g, lno_b], axis=0)               # (8, D)
        params.append(p)
        in_sz = D
    return params


def enssm_forward(x, params, nhead=TRANS_NHEAD):
    """x: (B, L, C_in).  Returns (B, L, output_sizes[-1]) in bf16."""
    out = x.astype(jnp.bfloat16)                 # bf16 inter-layer activations
    for p in params:
        B, L, C_in = out.shape
        D = p['D']
        proj = _make_proj_call(B, L, C_in, D, p['has_skip'], nhead)
        args = [out, out, out, p['wconv'], p['proj_bias']]
        if p['has_skip']:
            args.append(p['skipw'])
        args.append(p['wqkv'])
        t_in, q, k, v = proj(*args)
        attn_ffn = _make_attn_ffn_call(B, L, D, nhead)
        out = attn_ffn(t_in, q, k, v, p['wo'], p['w1'], p['w2'],
                       p['b1'], p['vecs'])
    return out


# ---------------------------------------------------------------------------
# pure-JAX reference (same eval-mode semantics, mostly f32 math)
# ---------------------------------------------------------------------------
def enssm_reference(x, params, nhead=TRANS_NHEAD):
    out = x.astype(jnp.bfloat16).astype(jnp.float32)
    for p in params:
        B, L, _ = out.shape
        D = p['D']
        hd = D // nhead
        wconv = p['wconv'].astype(jnp.float32)       # BN scale already folded
        c0, c1, c2 = wconv[:, :D], wconv[:, D:2 * D], wconv[:, 2 * D:]
        xpad = jnp.pad(out, ((0, 0), (1, 1), (0, 0)))
        conv = (xpad[:, 0:L] @ c0 + xpad[:, 1:L + 1] @ c1
                + xpad[:, 2:L + 2] @ c2 + p['proj_bias'][0])
        y = jnp.maximum(conv, 0.0)
        res = out @ p['skipw'].astype(jnp.float32) if p['has_skip'] else out
        t_in = (y + res).astype(jnp.bfloat16).astype(jnp.float32)

        qkv = t_in @ p['wqkv'].astype(jnp.float32)
        q = qkv[..., :D] + p['proj_bias'][1]          # 1/sqrt(hd) already folded
        k = qkv[..., D:2 * D] + p['proj_bias'][2]
        v = qkv[..., 2 * D:] + p['proj_bias'][3]

        def split(z):
            return z.reshape(B, L, nhead, hd).transpose(0, 2, 1, 3)

        qh, kh, vh = split(q), split(k), split(v)
        s = jnp.einsum('bhld,bhmd->bhlm', qh, kh)
        pw = jax.nn.softmax(s, axis=-1)
        ah = jnp.einsum('bhlm,bhmd->bhld', pw, vh)
        attn = ah.transpose(0, 2, 1, 3).reshape(B, L, D)
        vecs = p['vecs']
        attn = attn @ p['wo'].astype(jnp.float32) + vecs[0]

        def ln(z, g, b, eps):
            mu = z.mean(-1, keepdims=True)
            var = ((z - mu) ** 2).mean(-1, keepdims=True)
            return (z - mu) / jnp.sqrt(var + eps) * g + b

        x1 = ln(t_in + attn, vecs[2], vecs[3], 1e-5)
        ff = jnp.maximum(x1 @ p['w1'].astype(jnp.float32) + p['b1'], 0.0)
        ff = ff @ p['w2'].astype(jnp.float32) + vecs[1]
        x2 = ln(x1 + ff, vecs[4], vecs[5], 1e-5)
        out = t_in + ln(x2, vecs[6], vecs[7], 1e-6)
        out = out.astype(jnp.bfloat16).astype(jnp.float32)  # mirror bf16 handoff
    return out


if __name__ == "__main__":
    key = jax.random.PRNGKey(0)
    kx, kp = jax.random.split(key)

    B, L, C_in = 2, 8, 16
    output_sizes = (32, 32)   # layer 0: 1x1-skip-conv path, layer 1: identity skip

    x = jax.random.normal(kx, (B, L, C_in), jnp.float32)
    params = init_enssm_params(kp, C_in, output_sizes)

    out = jax.block_until_ready(enssm_forward(x, params))
    assert out.shape == (B, L, output_sizes[-1])
    out_f32 = out.astype(jnp.float32)
    assert bool(jnp.all(jnp.isfinite(out_f32)))

    # Sanity-check against the pure-JAX reference (loose tol: bf16 weights /
    # activations + approx softmax reciprocal in the kernel).
    ref = enssm_reference(x, params)
    err = float(jnp.max(jnp.abs(out_f32 - ref)))
    assert err < 0.5, f"kernel vs reference max abs err = {err}"
    print("KERNEL_OK")
</pallas_src>

<mosaic_0001>
module attributes {stable_mosaic.version = 11 : i64} {
  func.func @_k(%arg0: i32, %arg1: memref<8x128xf32, #tpu.memory_space<vmem>>, %arg2: memref<8x128xf32, #tpu.memory_space<vmem>>) attributes {dimension_semantics = [#tpu.dimension_semantics<arbitrary>], iteration_bounds = array<i64: 2>, scalar_prefetch = 0 : i64, scratch_operands = 0 : i64, tpu.core_type = #tpu.core_type<tc>, window_params = [{pipeline_mode = #tpu.pipeline_mode<synchronous>, transform_indices = @transform_0, window_bounds = array<i64: 8, 128>}, {pipeline_mode = #tpu.pipeline_mode<synchronous>, transform_indices = @transform_1, window_bounds = array<i64: 8, 128>}]} {
    %c0 = arith.constant 0 : index
    %c0_0 = arith.constant 0 : index
    %0 = vector.load %arg1[%c0, %c0_0] : memref<8x128xf32, #tpu.memory_space<vmem>>, vector<8x128xf32>
    %cst = arith.constant 1.000000e+00 : f32
    %1 = vector.broadcast %cst : f32 to vector<8x128xf32>
    %2 = arith.addf %0, %1 : vector<8x128xf32>
    %c0_1 = arith.constant 0 : index
    %c0_2 = arith.constant 0 : index
    %3 = vector.load %arg2[%c0_1, %c0_2] : memref<8x128xf32, #tpu.memory_space<vmem>>, vector<8x128xf32>
    tpu.vector_store %arg2[%c0_1, %c0_2], %2 {strides = array<i32>} : memref<8x128xf32, #tpu.memory_space<vmem>>, vector<8x128xf32>,
    return
  }
  func.func @transform_0(%arg0: i32) -> (i32, i32) {
    %c0_i32 = arith.constant 0 : i32
    %c0_i32_0 = arith.constant 0 : i32
    %c0_i32_1 = arith.constant 0 : i32
    return %c0_i32, %c0_i32_0 : i32, i32
  }
  func.func @transform_1(%arg0: i32) -> (i32, i32) {
    %c0_i32 = arith.constant 0 : i32
    %c0_i32_0 = arith.constant 0 : i32
    %c0_i32_1 = arith.constant 0 : i32
    return %c0_i32, %c0_i32_0 : i32, i32
  }
}

module attributes {stable_mosaic.version = 11 : i64} {
  func.func @_proj_kernel(%arg0: i32, %arg1: i32, %arg2: memref<1x8x16xbf16, #tpu.memory_space<vmem>>, %arg3: memref<1x8x16xbf16, #tpu.memory_space<vmem>>, %arg4: memref<1x8x16xbf16, #tpu.memory_space<vmem>>, %arg5: memref<16x96xbf16, #tpu.memory_space<vmem>>, %arg6: memref<4x32xf32, #tpu.memory_space<vmem>>, %arg7: memref<16x32xbf16, #tpu.memory_space<vmem>>, %arg8: memref<32x96xbf16, #tpu.memory_space<vmem>>, %arg9: memref<1x8x32xbf16, #tpu.memory_space<vmem>>, %arg10: memref<1x8x8x4xbf16, #tpu.memory_space<vmem>>, %arg11: memref<1x8x8x4xbf16, #tpu.memory_space<vmem>>, %arg12: memref<1x8x8x4xbf16, #tpu.memory_space<vmem>>) attributes {dimension_semantics = [#tpu.dimension_semantics<parallel>, #tpu.dimension_semantics<parallel>], iteration_bounds = array<i64: 2, 1>, scalar_prefetch = 0 : i64, scratch_operands = 0 : i64, tpu.core_type = #tpu.core_type<tc>, window_params = [{transform_indices = @transform_0, window_bounds = array<i64: 1, 8, 16>}, {transform_indices = @transform_1, window_bounds = array<i64: 1, 8, 16>}, {transform_indices = @transform_2, window_bounds = array<i64: 1, 8, 16>}, {pipeline_mode = #tpu.pipeline_mode<synchronous>, transform_indices = @transform_3, window_bounds = array<i64: 16, 96>}, {pipeline_mode = #tpu.pipeline_mode<synchronous>, transform_indices = @transform_4, window_bounds = array<i64: 4, 32>}, {pipeline_mode = #tpu.pipeline_mode<synchronous>, transform_indices = @transform_5, window_bounds = array<i64: 16, 32>}, {pipeline_mode = #tpu.pipeline_mode<synchronous>, transform_indices = @transform_6, window_bounds = array<i64: 32, 96>}, {transform_indices = @transform_7, window_bounds = array<i64: 1, 8, 32>}, {transform_indices = @transform_8, window_bounds = array<i64: 1, 8, 8, 4>}, {transform_indices = @transform_9, window_bounds = array<i64: 1, 8, 8, 4>}, {transform_indices = @transform_10, window_bounds = array<i64: 1, 8, 8, 4>}]} {
    %c0 = arith.constant 0 : index
    %c0_0 = arith.constant 0 : index
    %c0_1 = arith.constant 0 : index
    %0 = vector.load %arg2[%c0, %c0_0, %c0_1] : memref<1x8x16xbf16, #tpu.memory_space<vmem>>, vector<1x8x16xbf16>
    %1 = vector.shape_cast %0 : vector<1x8x16xbf16> to vector<8x16xbf16>
    %c0_2 = arith.constant 0 : index
    %c0_3 = arith.constant 0 : index
    %2 = vector.load %arg5[%c0_2, %c0_3] : memref<16x96xbf16, #tpu.memory_space<vmem>>, vector<16x96xbf16>
    %cst = arith.constant dense<0.000000e+00> : vector<8x96xf32>
    %3 = tpu.matmul %1, %2, %cst {dimension_numbers = #tpu.dot_dimension_numbers<[1], [0], [0], [1], [0, 0, 1, 1], [], []>} : vector<8x16xbf16>, vector<16x96xbf16>, vector<8x96xf32> -> vector<8x96xf32>
    %4 = vector.extract_strided_slice %3 {offsets = [0, 0], sizes = [8, 32], strides = [1, 1]} : vector<8x96xf32> to vector<8x32xf32>
    %5 = vector.extract_strided_slice %3 {offsets = [0, 32], sizes = [8, 32], strides = [1, 1]} : vector<8x96xf32> to vector<8x32xf32>
    %6 = vector.extract_strided_slice %3 {offsets = [0, 64], sizes = [8, 32], strides = [1, 1]} : vector<8x96xf32> to vector<8x32xf32>
    %c0_4 = arith.constant 0 : index
    %c7 = arith.constant 7 : index
    %c0_5 = arith.constant 0 : index
    %7 = vector.load %arg3[%c0_4, %c7, %c0_5] : memref<1x8x16xbf16, #tpu.memory_space<vmem>>, vector<1x1x16xbf16>
    %8 = vector.shape_cast %7 : vector<1x1x16xbf16> to vector<1x16xbf16>
    %c0_6 = arith.constant 0 : index
    %c0_7 = arith.constant 0 : index
    %9 = vector.load %arg5[%c0_6, %c0_7] : memref<16x96xbf16, #tpu.memory_space<vmem>>, vector<16x96xbf16>
    %cst_8 = arith.constant dense<0.000000e+00> : vector<1x96xf32>
    %10 = tpu.matmul %8, %9, %cst_8 {dimension_numbers = #tpu.dot_dimension_numbers<[1], [0], [0], [1], [0, 0, 1, 1], [], []>} : vector<1x16xbf16>, vector<16x96xbf16>, vector<1x96xf32> -> vector<1x96xf32>
    %11 = vector.extract_strided_slice %10 {offsets = [0, 0], sizes = [1, 32], strides = [1, 1]} : vector<1x96xf32> to vector<1x32xf32>
    %c0_9 = arith.constant 0 : index
    %c0_10 = arith.constant 0 : index
    %c0_11 = arith.constant 0 : index
    %12 = vector.load %arg4[%c0_9, %c0_10, %c0_11] : memref<1x8x16xbf16, #tpu.memory_space<vmem>>, vector<1x1x16xbf16>
    %13 = vector.shape_cast %12 : vector<1x1x16xbf16> to vector<1x16xbf16>
    %c0_12 = arith.constant 0 : index
    %c0_13 = arith.constant 0 : index
    %14 = vector.load %arg5[%c0_12, %c0_13] : memref<16x96xbf16, #tpu.memory_space<vmem>>, vector<16x96xbf16>
    %cst_14 = arith.constant dense<0.000000e+00> : vector<1x96xf32>
    %15 = tpu.matmul %13, %14, %cst_14 {dimension_numbers = #tpu.dot_dimension_numbers<[1], [0], [0], [1], [0, 0, 1, 1], [], []>} : vector<1x16xbf16>, vector<16x96xbf16>, vector<1x96xf32> -> vector<1x96xf32>
    %16 = vector.extract_strided_slice %15 {offsets = [0, 64], sizes = [1, 32], strides = [1, 1]} : vector<1x96xf32> to vector<1x32xf32>
    %c0_i32 = arith.constant 0 : i32
    %17 = arith.cmpi sgt, %arg1, %c0_i32 : i32
    %18 = arith.extui %17 : i1 to i32
    %19 = arith.sitofp %18 : i32 to f32
    %20 = vector.broadcast %19 : f32 to vector<1x32xf32>
    %21 = arith.mulf %11, %20 : vector<1x32xf32>
    %c0_i32_15 = arith.constant 0 : i32
    %22 = arith.cmpi slt, %arg1, %c0_i32_15 : i32
    %23 = arith.extui %22 : i1 to i32
    %24 = arith.sitofp %23 : i32 to f32
    %25 = vector.broadcast %24 : f32 to vector<1x32xf32>
    %26 = arith.mulf %16, %25 : vector<1x32xf32>
    %27 = tpu.iota {dimensions = array<i32: 0>} : vector<8x32xi32>
    %c0_i32_16 = arith.constant 0 : i32
    %28 = vector.broadcast %c0_i32_16 : i32 to vector<8x32xi32>
    %29 = arith.cmpi eq, %27, %28 : vector<8x32xi32>
    %c1_i32 = arith.constant 1 : i32
    %30 = tpu.dynamic_rotate %4 by %c1_i32 dim 0 : vector<8x32xf32>, i32 -> vector<8x32xf32>
    %31 = vector.shape_cast %21 : vector<1x32xf32> to vector<1x32xf32>
    %32 = vector.broadcast %31 : vector<1x32xf32> to vector<8x32xf32>
    %33 = arith.select %29, %32, %30 : vector<8x32xi1>, vector<8x32xf32>
    %c7_i32 = arith.constant 7 : i32
    %34 = vector.broadcast %c7_i32 : i32 to vector<8x32xi32>
    %35 = arith.cmpi eq, %27, %34 : vector<8x32xi32>
    %c7_i32_17 = arith.constant 7 : i32
    %36 = tpu.dynamic_rotate %6 by %c7_i32_17 dim 0 : vector<8x32xf32>, i32 -> vector<8x32xf32>
    %37 = vector.shape_cast %26 : vector<1x32xf32> to vector<1x32xf32>
    %38 = vector.broadcast %37 : vector<1x32xf32> to vector<8x32xf32>
    %39 = arith.select %35, %38, %36 : vector<8x32xi1>, vector<8x32xf32>
    %40 = arith.addf %33, %5 : vector<8x32xf32>
    %41 = arith.addf %40, %39 : vector<8x32xf32>
    %c0_18 = arith.constant 0 : index
    %c0_19 = arith.constant 0 : index
    %42 = vector.load %arg6[%c0_18, %c0_19] : memref<4x32xf32, #tpu.memory_space<vmem>>, vector<1x32xf32>
    %43 = vector.broadcast %42 : vector<1x32xf32> to vector<8x32xf32>
    %44 = arith.addf %41, %43 : vector<8x32xf32>
    %cst_20 = arith.constant 0.000000e+00 : f32
    %45 = vector.broadcast %cst_20 : f32 to vector<8x32xf32>
    %46 = arith.maximumf %44, %45 : vector<8x32xf32>
    %c0_21 = arith.constant 0 : index
    %c0_22 = arith.constant 0 : index
    %47 = vector.load %arg7[%c0_21, %c0_22] : memref<16x32xbf16, #tpu.memory_space<vmem>>, vector<16x32xbf16>
    %cst_23 = arith.constant dense<0.000000e+00> : vector<8x32xf32>
    %48 = tpu.matmul %1, %47, %cst_23 {dimension_numbers = #tpu.dot_dimension_numbers<[1], [0], [0], [1], [0, 0, 1, 1], [], []>} : vector<8x16xbf16>, vector<16x32xbf16>, vector<8x32xf32> -> vector<8x32xf32>
    %49 = arith.addf %46, %48 : vector<8x32xf32>
    %50 = arith.truncf %49 : vector<8x32xf32> to vector<8x32xbf16>
    %c0_24 = arith.constant 0 : index
    %c0_25 = arith.constant 0 : index
    %c0_26 = arith.constant 0 : index
    %51 = vector.load %arg9[%c0_24, %c0_25, %c0_26] : memref<1x8x32xbf16, #tpu.memory_space<vmem>>, vector<1x8x32xbf16>
    %52 = vector.shape_cast %51 : vector<1x8x32xbf16> to vector<8x32xbf16>
    %53 = vector.shape_cast %50 : vector<8x32xbf16> to vector<1x8x32xbf16>
    tpu.vector_store %arg9[%c0_24, %c0_25, %c0_26], %53 {strides = array<i32>} : memref<1x8x32xbf16, #tpu.memory_space<vmem>>, vector<1x8x32xbf16>,
    %54 = arith.truncf %49 : vector<8x32xf32> to vector<8x32xbf16>
    %c0_27 = arith.constant 0 : index
    %c0_28 = arith.constant 0 : index
    %55 = vector.load %arg8[%c0_27, %c0_28] : memref<32x96xbf16, #tpu.memory_space<vmem>>, vector<32x96xbf16>
    %cst_29 = arith.constant dense<0.000000e+00> : vector<8x96xf32>
    %56 = tpu.matmul %54, %55, %cst_29 {dimension_numbers = #tpu.dot_dimension_numbers<[1], [0], [0], [1], [0, 0, 1, 1], [], []>} : vector<8x32xbf16>, vector<32x96xbf16>, vector<8x96xf32> -> vector<8x96xf32>
    %57 = vector.extract_strided_slice %56 {offsets = [0, 0], sizes = [8, 32], strides = [1, 1]} : vector<8x96xf32> to vector<8x32xf32>
    %c1 = arith.constant 1 : index
    %c0_30 = arith.constant 0 : index
    %58 = vector.load %arg6[%c1, %c0_30] : memref<4x32xf32, #tpu.memory_space<vmem>>, vector<1x32xf32>
    %59 = vector.broadcast %58 : vector<1x32xf32> to vector<8x32xf32>
    %60 = arith.addf %57, %59 : vector<8x32xf32>
    %61 = vector.extract_strided_slice %56 {offsets = [0, 32], sizes = [8, 32], strides = [1, 1]} : vector<8x96xf32> to vector<8x32xf32>
    %c2 = arith.constant 2 : index
    %c0_31 = arith.constant 0 : index
    %62 = vector.load %arg6[%c2, %c0_31] : memref<4x32xf32, #tpu.memory_space<vmem>>, vector<1x32xf32>
    %63 = vector.broadcast %62 : vector<1x32xf32> to vector<8x32xf32>
    %64 = arith.addf %61, %63 : vector<8x32xf32>
    %65 = vector.extract_strided_slice %56 {offsets = [0, 64], sizes = [8, 32], strides = [1, 1]} : vector<8x96xf32> to vector<8x32xf32>
    %c3 = arith.constant 3 : index
    %c0_32 = arith.constant 0 : index
    %66 = vector.load %arg6[%c3, %c0_32] : memref<4x32xf32, #tpu.memory_space<vmem>>, vector<1x32xf32>
    %67 = vector.broadcast %66 : vector<1x32xf32> to vector<8x32xf32>
    %68 = arith.addf %65, %67 : vector<8x32xf32>
    %69 = vector.extract_strided_slice %60 {offsets = [0, 0], sizes = [8, 4], strides = [1, 1]} : vector<8x32xf32> to vector<8x4xf32>
    %70 = arith.truncf %69 : vector<8x4xf32> to vector<8x4xbf16>
    %c0_33 = arith.constant 0 : index
    %c0_34 = arith.constant 0 : index
    %c0_35 = arith.constant 0 : index
    %c0_36 = arith.constant 0 : index
    %71 = vector.load %arg10[%c0_33, %c0_34, %c0_35, %c0_36] : memref<1x8x8x4xbf16, #tpu.memory_space<vmem>>, vector<1x1x8x4xbf16>
    %72 = vector.shape_cast %71 : vector<1x1x8x4xbf16> to vector<8x4xbf16>
    %73 = vector.shape_cast %70 : vector<8x4xbf16> to vector<1x1x8x4xbf16>
    tpu.vector_store %arg10[%c0_33, %c0_34, %c0_35, %c0_36], %73 {strides = array<i32>} : memref<1x8x8x4xbf16, #tpu.memory_space<vmem>>, vector<1x1x8x4xbf16>,
    %74 = vector.extract_strided_slice %64 {offsets = [0, 0], sizes = [8, 4], strides = [1, 1]} : vector<8x32xf32> to vector<8x4xf32>
    %75 = arith.truncf %74 : vector<8x4xf32> to vector<8x4xbf16>
    %c0_37 = arith.constant 0 : index
    %c0_38 = arith.constant 0 : index
    %c0_39 = arith.constant 0 : index
    %c0_40 = arith.constant 0 : index
    %76 = vector.load %arg11[%c0_37, %c0_38, %c0_39, %c0_40] : memref<1x8x8x4xbf16, #tpu.memory_space<vmem>>, vector<1x1x8x4xbf16>
    %77 = vector.shape_cast %76 : vector<1x1x8x4xbf16> to vector<8x4xbf16>
    %78 = vector.shape_cast %75 : vector<8x4xbf16> to vector<1x1x8x4xbf16>
    tpu.vector_store %arg11[%c0_37, %c0_38, %c0_39, %c0_40], %78 {strides = array<i32>} : memref<1x8x8x4xbf16, #tpu.memory_space<vmem>>, vector<1x1x8x4xbf16>,
    %79 = vector.extract_strided_slice %68 {offsets = [0, 0], sizes = [8, 4], strides = [1, 1]} : vector<8x32xf32> to vector<8x4xf32>
    %80 = arith.truncf %79 : vector<8x4xf32> to vector<8x4xbf16>
    %c0_41 = arith.constant 0 : index
    %c0_42 = arith.constant 0 : index
    %c0_43 = arith.constant 0 : index
    %c0_44 = arith.constant 0 : index
    %81 = vector.load %arg12[%c0_41, %c0_42, %c0_43, %c0_44] : memref<1x8x8x4xbf16, #tpu.memory_space<vmem>>, vector<1x1x8x4xbf16>
    %82 = vector.shape_cast %81 : vector<1x1x8x4xbf16> to vector<8x4xbf16>
    %83 = vector.shape_cast %80 : vector<8x4xbf16> to vector<1x1x8x4xbf16>
    tpu.vector_store %arg12[%c0_41, %c0_42, %c0_43, %c0_44], %83 {strides = array<i32>} : memref<1x8x8x4xbf16, #tpu.memory_space<vmem>>, vector<1x1x8x4xbf16>,
    %84 = vector.extract_strided_slice %60 {offsets = [0, 4], sizes = [8, 4], strides = [1, 1]} : vector<8x32xf32> to vector<8x4xf32>
    %85 = arith.truncf %84 : vector<8x4xf32> to vector<8x4xbf16>
    %c0_45 = arith.constant 0 : index
    %c1_46 = arith.constant 1 : index
    %c0_47 = arith.constant 0 : index
    %c0_48 = arith.constant 0 : index
    %86 = vector.load %arg10[%c0_45, %c1_46, %c0_47, %c0_48] : memref<1x8x8x4xbf16, #tpu.memory_space<vmem>>, vector<1x1x8x4xbf16>
    %87 = vector.shape_cast %86 : vector<1x1x8x4xbf16> to vector<8x4xbf16>
    %88 = vector.shape_cast %85 : vector<8x4xbf16> to vector<1x1x8x4xbf16>
    tpu.vector_store %arg10[%c0_45, %c1_46, %c0_47, %c0_48], %88 {strides = array<i32>} : memref<1x8x8x4xbf16, #tpu.memory_space<vmem>>, vector<1x1x8x4xbf16>,
    %89 = vector.extract_strided_slice %64 {offsets = [0, 4], sizes = [8, 4], strides = [1, 1]} : vector<8x32xf32> to vector<8x4xf32>
    %90 = arith.truncf %89 : vector<8x4xf32> to vector<8x4xbf16>
    %c0_49 = arith.constant 0 : index
    %c1_50 = arith.constant 1 : index
    %c0_51 = arith.constant 0 : index
    %c0_52 = arith.constant 0 : index
    %91 = vector.load %arg11[%c0_49, %c1_50, %c0_51, %c0_52] : memref<1x8x8x4xbf16, #tpu.memory_space<vmem>>, vector<1x1x8x4xbf16>
    %92 = vector.shape_cast %91 : vector<1x1x8x4xbf16> to vector<8x4xbf16>
    %93 = vector.shape_cast %90 : vector<8x4xbf16> to vector<1x1x8x4xbf16>
    tpu.vector_store %arg11[%c0_49, %c1_50, %c0_51, %c0_52], %93 {strides = array<i32>} : memref<1x8x8x4xbf16, #tpu.memory_space<vmem>>, vector<1x1x8x4xbf16>,
    %94 = vector.extract_strided_slice %68 {offsets = [0, 4], sizes = [8, 4], strides = [1, 1]} : vector<8x32xf32> to vector<8x4xf32>
    %95 = arith.truncf %94 : vector<8x4xf32> to vector<8x4xbf16>
    %c0_53 = arith.constant 0 : index
    %c1_54 = arith.constant 1 : index
    %c0_55 = arith.constant 0 : index
    %c0_56 = arith.constant 0 : index
    %96 = vector.load %arg12[%c0_53, %c1_54, %c0_55, %c0_56] : memref<1x8x8x4xbf16, #tpu.memory_space<vmem>>, vector<1x1x8x4xbf16>
    %97 = vector.shape_cast %96 : vector<1x1x8x4xbf16> to vector<8x4xbf16>
    %98 = vector.shape_cast %95 : vector<8x4xbf16> to vector<1x1x8x4xbf16>
    tpu.vector_store %arg12[%c0_53, %c1_54, %c0_55, %c0_56], %98 {strides = array<i32>} : memref<1x8x8x4xbf16, #tpu.memory_space<vmem>>, vector<1x1x8x4xbf16>,
    %99 = vector.extract_strided_slice %60 {offsets = [0, 8], sizes = [8, 4], strides = [1, 1]} : vector<8x32xf32> to vector<8x4xf32>
    %100 = arith.truncf %99 : vector<8x4xf32> to vector<8x4xbf16>
    %c0_57 = arith.constant 0 : index
    %c2_58 = arith.constant 2 : index
    %c0_59 = arith.constant 0 : index
    %c0_60 = arith.constant 0 : index
    %101 = vector.load %arg10[%c0_57, %c2_58, %c0_59, %c0_60] : memref<1x8x8x4xbf16, #tpu.memory_space<vmem>>, vector<1x1x8x4xbf16>
    %102 = vector.shape_cast %101 : vector<1x1x8x4xbf16> to vector<8x4xbf16>
    %103 = vector.shape_cast %100 : vector<8x4xbf16> to vector<1x1x8x4xbf16>
    tpu.vector_store %arg10[%c0_57, %c2_58, %c0_59, %c0_60], %103 {strides = array<i32>} : memref<1x8x8x4xbf16, #tpu.memory_space<vmem>>, vector<1x1x8x4xbf16>,
    %104 = vector.extract_strided_slice %64 {offsets = [0, 8], sizes = [8, 4], strides = [1, 1]} : vector<8x32xf32> to vector<8x4xf32>
    %105 = arith.truncf %104 : vector<8x4xf32> to vector<8x4xbf16>
    %c0_61 = arith.constant 0 : index
    %c2_62 = arith.constant 2 : index
    %c0_63 = arith.constant 0 : index
    %c0_64 = arith.constant 0 : index
    %106 = vector.load %arg11[%c0_61, %c2_62, %c0_63, %c0_64] : memref<1x8x8x4xbf16, #tpu.memory_space<vmem>>, vector<1x1x8x4xbf16>
    %107 = vector.shape_cast %106 : vector<1x1x8x4xbf16> to vector<8x4xbf16>
    %108 = vector.shape_cast %105 : vector<8x4xbf16> to vector<1x1x8x4xbf16>
    tpu.vector_store %arg11[%c0_61, %c2_62, %c0_63, %c0_64], %108 {strides = array<i32>} : memref<1x8x8x4xbf16, #tpu.memory_space<vmem>>, vector<1x1x8x4xbf16>,
    %109 = vector.extract_strided_slice %68 {offsets = [0, 8], sizes = [8, 4], strides = [1, 1]} : vector<8x32xf32> to vector<8x4xf32>
    %110 = arith.truncf %109 : vector<8x4xf32> to vector<8x4xbf16>
    %c0_65 = arith.constant 0 : index
    %c2_66 = arith.constant 2 : index
    %c0_67 = arith.constant 0 : index
    %c0_68 = arith.constant 0 : index
    %111 = vector.load %arg12[%c0_65, %c2_66, %c0_67, %c0_68] : memref<1x8x8x4xbf16, #tpu.memory_space<vmem>>, vector<1x1x8x4xbf16>
    %112 = vector.shape_cast %111 : vector<1x1x8x4xbf16> to vector<8x4xbf16>
    %113 = vector.shape_cast %110 : vector<8x4xbf16> to vector<1x1x8x4xbf16>
    tpu.vector_store %arg12[%c0_65, %c2_66, %c0_67, %c0_68], %113 {strides = array<i32>} : memref<1x8x8x4xbf16, #tpu.memory_space<vmem>>, vector<1x1x8x4xbf16>,
    %114 = vector.extract_strided_slice %60 {offsets = [0, 12], sizes = [8, 4], strides = [1, 1]} : vector<8x32xf32> to vector<8x4xf32>
    %115 = arith.truncf %114 : vector<8x4xf32> to vector<8x4xbf16>
    %c0_69 = arith.constant 0 : index
    %c3_70 = arith.constant 3 : index
    %c0_71 = arith.constant 0 : index
    %c0_72 = arith.constant 0 : index
    %116 = vector.load %arg10[%c0_69, %c3_70, %c0_71, %c0_72] : memref<1x8x8x4xbf16, #tpu.memory_space<vmem>>, vector<1x1x8x4xbf16>
    %117 = vector.shape_cast %116 : vector<1x1x8x4xbf16> to vector<8x4xbf16>
    %118 = vector.shape_cast %115 : vector<8x4xbf16> to vector<1x1x8x4xbf16>
    tpu.vector_store %arg10[%c0_69, %c3_70, %c0_71, %c0_72], %118 {strides = array<i32>} : memref<1x8x8x4xbf16, #tpu.memory_space<vmem>>, vector<1x1x8x4xbf16>,
    %119 = vector.extract_strided_slice %64 {offsets = [0, 12], sizes = [8, 4], strides = [1, 1]} : vector<8x32xf32> to vector<8x4xf32>
    %120 = arith.truncf %119 : vector<8x4xf32> to vector<8x4xbf16>
    %c0_73 = arith.constant 0 : index
    %c3_74 = arith.constant 3 : index
    %c0_75 = arith.constant 0 : index
    %c0_76 = arith.constant 0 : index
    %121 = vector.load %arg11[%c0_73, %c3_74, %c0_75, %c0_76] : memref<1x8x8x4xbf16, #tpu.memory_space<vmem>>, vector<1x1x8x4xbf16>
    %122 = vector.shape_cast %121 : vector<1x1x8x4xbf16> to vector<8x4xbf16>
    %123 = vector.shape_cast %120 : vector<8x4xbf16> to vector<1x1x8x4xbf16>
    tpu.vector_store %arg11[%c0_73, %c3_74, %c0_75, %c0_76], %123 {strides = array<i32>} : memref<1x8x8x4xbf16, #tpu.memory_space<vmem>>, vector<1x1x8x4xbf16>,
    %124 = vector.extract_strided_slice %68 {offsets = [0, 12], sizes = [8, 4], strides = [1, 1]} : vector<8x32xf32> to vector<8x4xf32>
    %125 = arith.truncf %124 : vector<8x4xf32> to vector<8x4xbf16>
    %c0_77 = arith.constant 0 : index
    %c3_78 = arith.constant 3 : index
    %c0_79 = arith.constant 0 : index
    %c0_80 = arith.constant 0 : index
    %126 = vector.load %arg12[%c0_77, %c3_78, %c0_79, %c0_80] : memref<1x8x8x4xbf16, #tpu.memory_space<vmem>>, vector<1x1x8x4xbf16>
    %127 = vector.shape_cast %126 : vector<1x1x8x4xbf16> to vector<8x4xbf16>
    %128 = vector.shape_cast %125 : vector<8x4xbf16> to vector<1x1x8x4xbf16>
    tpu.vector_store %arg12[%c0_77, %c3_78, %c0_79, %c0_80], %128 {strides = array<i32>} : memref<1x8x8x4xbf16, #tpu.memory_space<vmem>>, vector<1x1x8x4xbf16>,
    %129 = vector.extract_strided_slice %60 {offsets = [0, 16], sizes = [8, 4], strides = [1, 1]} : vector<8x32xf32> to vector<8x4xf32>
    %130 = arith.truncf %129 : vector<8x4xf32> to vector<8x4xbf16>
    %c0_81 = arith.constant 0 : index
    %c4 = arith.constant 4 : index
    %c0_82 = arith.constant 0 : index
    %c0_83 = arith.constant 0 : index
    %131 = vector.load %arg10[%c0_81, %c4, %c0_82, %c0_83] : memref<1x8x8x4xbf16, #tpu.memory_space<vmem>>, vector<1x1x8x4xbf16>
    %132 = vector.shape_cast %131 : vector<1x1x8x4xbf16> to vector<8x4xbf16>
    %133 = vector.shape_cast %130 : vector<8x4xbf16> to vector<1x1x8x4xbf16>
    tpu.vector_store %arg10[%c0_81, %c4, %c0_82, %c0_83], %133 {strides = array<i32>} : memref<1x8x8x4xbf16, #tpu.memory_space<vmem>>, vector<1x1x8x4xbf16>,
    %134 = vector.extract_strided_slice %64 {offsets = [0, 16], sizes = [8, 4], strides = [1, 1]} : vector<8x32xf32> to vector<8x4xf32>
    %135 = arith.truncf %134 : vector<8x4xf32> to vector<8x4xbf16>
    %c0_84 = arith.constant 0 : index
    %c4_85 = arith.constant 4 : index
    %c0_86 = arith.constant 0 : index
    %c0_87 = arith.constant 0 : index
    %136 = vector.load %arg11[%c0_84, %c4_85, %c0_86, %c0_87] : memref<1x8x8x4xbf16, #tpu.memory_space<vmem>>, vector<1x1x8x4xbf16>
    %137 = vector.shape_cast %136 : vector<1x1x8x4xbf16> to vector<8x4xbf16>
    %138 = vector.shape_cast %135 : vector<8x4xbf16> to vector<1x1x8x4xbf16>
    tpu.vector_store %arg11[%c0_84, %c4_85, %c0_86, %c0_87], %138 {strides = array<i32>} : memref<1x8x8x4xbf16, #tpu.memory_space<vmem>>, vector<1x1x8x4xbf16>,
    %139 = vector.extract_strided_slice %68 {offsets = [0, 16], sizes = [8, 4], strides = [1, 1]} : vector<8x32xf32> to vector<8x4xf32>
    %140 = arith.truncf %139 : vector<8x4xf32> to vector<8x4xbf16>
    %c0_88 = arith.constant 0 : index
    %c4_89 = arith.constant 4 : index
    %c0_90 = arith.constant 0 : index
    %c0_91 = arith.constant 0 : index
    %141 = vector.load %arg12[%c0_88, %c4_89, %c0_90, %c0_91] : memref<1x8x8x4xbf16, #tpu.memory_space<vmem>>, vector<1x1x8x4xbf16>
    %142 = vector.shape_cast %141 : vector<1x1x8x4xbf16> to vector<8x4xbf16>
    %143 = vector.shape_cast %140 : vector<8x4xbf16> to vector<1x1x8x4xbf16>
    tpu.vector_store %arg12[%c0_88, %c4_89, %c0_90, %c0_91], %143 {strides = array<i32>} : memref<1x8x8x4xbf16, #tpu.memory_space<vmem>>, vector<1x1x8x4xbf16>,
    %144 = vector.extract_strided_slice %60 {offsets = [0, 20], sizes = [8, 4], strides = [1, 1]} : vector<8x32xf32> to vector<8x4xf32>
    %145 = arith.truncf %144 : vector<8x4xf32> to vector<8x4xbf16>
    %c0_92 = arith.constant 0 : index
    %c5 = arith.constant 5 : index
    %c0_93 = arith.constant 0 : index
    %c0_94 = arith.constant 0 : index
    %146 = vector.load %arg10[%c0_92, %c5, %c0_93, %c0_94] : memref<1x8x8x4xbf16, #tpu.memory_space<vmem>>, vector<1x1x8x4xbf16>
    %147 = vector.shape_cast %146 : vector<1x1x8x4xbf16> to vector<8x4xbf16>
    %148 = vector.shape_cast %145 : vector<8x4xbf16> to vector<1x1x8x4xbf16>
    tpu.vector_store %arg10[%c0_92, %c5, %c0_93, %c0_94], %148 {strides = array<i32>} : memref<1x8x8x4xbf16, #tpu.memory_space<vmem>>, vector<1x1x8x4xbf16>,
    %149 = vector.extract_strided_slice %64 {offsets = [0, 20], sizes = [8, 4], strides = [1, 1]} : vector<8x32xf32> to vector<8x4xf32>
    %150 = arith.truncf %149 : vector<8x4xf32> to vector<8x4xbf16>
    %c0_95 = arith.constant 0 : index
    %c5_96 = arith.constant 5 : index
    %c0_97 = arith.constant 0 : index
    %c0_98 = arith.constant 0 : index
    %151 = vector.load %arg11[%c0_95, %c5_96, %c0_97, %c0_98] : memref<1x8x8x4xbf16, #tpu.memory_space<vmem>>, vector<1x1x8x4xbf16>
    %152 = vector.shape_cast %151 : vector<1x1x8x4xbf16> to vector<8x4xbf16>
    %153 = vector.shape_cast %150 : vector<8x4xbf16> to vector<1x1x8x4xbf16>
    tpu.vector_store %arg11[%c0_95, %c5_96, %c0_97, %c0_98], %153 {strides = array<i32>} : memref<1x8x8x4xbf16, #tpu.memory_space<vmem>>, vector<1x1x8x4xbf16>,
    %154 = vector.extract_strided_slice %68 {offsets = [0, 20], sizes = [8, 4], strides = [1, 1]} : vector<8x32xf32> to vector<8x4xf32>
    %155 = arith.truncf %154 : vector<8x4xf32> to vector<8x4xbf16>
    %c0_99 = arith.constant 0 : index
    %c5_100 = arith.constant 5 : index
    %c0_101 = arith.constant 0 : index
    %c0_102 = arith.constant 0 : index
    %156 = vector.load %arg12[%c0_99, %c5_100, %c0_101, %c0_102] : memref<1x8x8x4xbf16, #tpu.memory_space<vmem>>, vector<1x1x8x4xbf16>
    %157 = vector.shape_cast %156 : vector<1x1x8x4xbf16> to vector<8x4xbf16>
    %158 = vector.shape_cast %155 : vector<8x4xbf16> to vector<1x1x8x4xbf16>
    tpu.vector_store %arg12[%c0_99, %c5_100, %c0_101, %c0_102], %158 {strides = array<i32>} : memref<1x8x8x4xbf16, #tpu.memory_space<vmem>>, vector<1x1x8x4xbf16>,
    %159 = vector.extract_strided_slice %60 {offsets = [0, 24], sizes = [8, 4], strides = [1, 1]} : vector<8x32xf32> to vector<8x4xf32>
    %160 = arith.truncf %159 : vector<8x4xf32> to vector<8x4xbf16>
    %c0_103 = arith.constant 0 : index
    %c6 = arith.constant 6 : index
    %c0_104 = arith.constant 0 : index
    %c0_105 = arith.constant 0 : index
    %161 = vector.load %arg10[%c0_103, %c6, %c0_104, %c0_105] : memref<1x8x8x4xbf16, #tpu.memory_space<vmem>>, vector<1x1x8x4xbf16>
    %162 = vector.shape_cast %161 : vector<1x1x8x4xbf16> to vector<8x4xbf16>
    %163 = vector.shape_cast %160 : vector<8x4xbf16> to vector<1x1x8x4xbf16>
    tpu.vector_store %arg10[%c0_103, %c6, %c0_104, %c0_105], %163 {strides = array<i32>} : memref<1x8x8x4xbf16, #tpu.memory_space<vmem>>, vector<1x1x8x4xbf16>,
    %164 = vector.extract_strided_slice %64 {offsets = [0, 24], sizes = [8, 4], strides = [1, 1]} : vector<8x32xf32> to vector<8x4xf32>
    %165 = arith.truncf %164 : vector<8x4xf32> to vector<8x4xbf16>
    %c0_106 = arith.constant 0 : index
    %c6_107 = arith.constant 6 : index
    %c0_108 = arith.constant 0 : index
    %c0_109 = arith.constant 0 : index
    %166 = vector.load %arg11[%c0_106, %c6_107, %c0_108, %c0_109] : memref<1x8x8x4xbf16, #tpu.memory_space<vmem>>, vector<1x1x8x4xbf16>
    %167 = vector.shape_cast %166 : vector<1x1x8x4xbf16> to vector<8x4xbf16>
    %168 = vector.shape_cast %165 : vector<8x4xbf16> to vector<1x1x8x4xbf16>
    tpu.vector_store %arg11[%c0_106, %c6_107, %c0_108, %c0_109], %168 {strides = array<i32>} : memref<1x8x8x4xbf16, #tpu.memory_space<vmem>>, vector<1x1x8x4xbf16>,
    %169 = vector.extract_strided_slice %68 {offsets = [0, 24], sizes = [8, 4], strides = [1, 1]} : vector<8x32xf32> to vector<8x4xf32>
    %170 = arith.truncf %169 : vector<8x4xf32> to vector<8x4xbf16>
    %c0_110 = arith.constant 0 : index
    %c6_111 = arith.constant 6 : index
    %c0_112 = arith.constant 0 : index
    %c0_113 = arith.constant 0 : index
    %171 = vector.load %arg12[%c0_110, %c6_111, %c0_112, %c0_113] : memref<1x8x8x4xbf16, #tpu.memory_space<vmem>>, vector<1x1x8x4xbf16>
    %172 = vector.shape_cast %171 : vector<1x1x8x4xbf16> to vector<8x4xbf16>
    %173 = vector.shape_cast %170 : vector<8x4xbf16> to vector<1x1x8x4xbf16>
    tpu.vector_store %arg12[%c0_110, %c6_111, %c0_112, %c0_113], %173 {strides = array<i32>} : memref<1x8x8x4xbf16, #tpu.memory_space<vmem>>, vector<1x1x8x4xbf16>,
    %174 = vector.extract_strided_slice %60 {offsets = [0, 28], sizes = [8, 4], strides = [1, 1]} : vector<8x32xf32> to vector<8x4xf32>
    %175 = arith.truncf %174 : vector<8x4xf32> to vector<8x4xbf16>
    %c0_114 = arith.constant 0 : index
    %c7_115 = arith.constant 7 : index
    %c0_116 = arith.constant 0 : index
    %c0_117 = arith.constant 0 : index
    %176 = vector.load %arg10[%c0_114, %c7_115, %c0_116, %c0_117] : memref<1x8x8x4xbf16, #tpu.memory_space<vmem>>, vector<1x1x8x4xbf16>
    %177 = vector.shape_cast %176 : vector<1x1x8x4xbf16> to vector<8x4xbf16>
    %178 = vector.shape_cast %175 : vector<8x4xbf16> to vector<1x1x8x4xbf16>
    tpu.vector_store %arg10[%c0_114, %c7_115, %c0_116, %c0_117], %178 {strides = array<i32>} : memref<1x8x8x4xbf16, #tpu.memory_space<vmem>>, vector<1x1x8x4xbf16>,
    %179 = vector.extract_strided_slice %64 {offsets = [0, 28], sizes = [8, 4], strides = [1, 1]} : vector<8x32xf32> to vector<8x4xf32>
    %180 = arith.truncf %179 : vector<8x4xf32> to vector<8x4xbf16>
    %c0_118 = arith.constant 0 : index
    %c7_119 = arith.constant 7 : index
    %c0_120 = arith.constant 0 : index
    %c0_121 = arith.constant 0 : index
    %181 = vector.load %arg11[%c0_118, %c7_119, %c0_120, %c0_121] : memref<1x8x8x4xbf16, #tpu.memory_space<vmem>>, vector<1x1x8x4xbf16>
    %182 = vector.shape_cast %181 : vector<1x1x8x4xbf16> to vector<8x4xbf16>
    %183 = vector.shape_cast %180 : vector<8x4xbf16> to vector<1x1x8x4xbf16>
    tpu.vector_store %arg11[%c0_118, %c7_119, %c0_120, %c0_121], %183 {strides = array<i32>} : memref<1x8x8x4xbf16, #tpu.memory_space<vmem>>, vector<1x1x8x4xbf16>,
    %184 = vector.extract_strided_slice %68 {offsets = [0, 28], sizes = [8, 4], strides = [1, 1]} : vector<8x32xf32> to vector<8x4xf32>
    %185 = arith.truncf %184 : vector<8x4xf32> to vector<8x4xbf16>
    %c0_122 = arith.constant 0 : index
    %c7_123 = arith.constant 7 : index
    %c0_124 = arith.constant 0 : index
    %c0_125 = arith.constant 0 : index
    %186 = vector.load %arg12[%c0_122, %c7_123, %c0_124, %c0_125] : memref<1x8x8x4xbf16, #tpu.memory_space<vmem>>, vector<1x1x8x4xbf16>
    %187 = vector.shape_cast %186 : vector<1x1x8x4xbf16> to vector<8x4xbf16>
    %188 = vector.shape_cast %185 : vector<8x4xbf16> to vector<1x1x8x4xbf16>
    tpu.vector_store %arg12[%c0_122, %c7_123, %c0_124, %c0_125], %188 {strides = array<i32>} : memref<1x8x8x4xbf16, #tpu.memory_space<vmem>>, vector<1x1x8x4xbf16>,
    return
  }
  func.func @transform_0(%arg0: i32, %arg1: i32) -> (i32, i32, i32) {
    %c0_i32 = arith.constant 0 : i32
    %c0_i32_0 = arith.constant 0 : i32
    return %arg0, %arg1, %c0_i32 : i32, i32, i32
  }
  func.func @transform_1(%arg0: i32, %arg1: i32) -> (i32, i32, i32) {
    %c1_i32 = arith.constant 1 : i32
    %0 = arith.subi %arg1, %c1_i32 : i32
    %c0_i32 = arith.constant 0 : i32
    %1 = arith.maxsi %0, %c0_i32 : i32
    %c0_i32_0 = arith.constant 0 : i32
    %c0_i32_1 = arith.constant 0 : i32
    return %arg0, %1, %c0_i32_0 : i32, i32, i32
  }
  func.func @transform_2(%arg0: i32, %arg1: i32) -> (i32, i32, i32) {
    %c1_i32 = arith.constant 1 : i32
    %0 = arith.addi %arg1, %c1_i32 : i32
    %c0_i32 = arith.constant 0 : i32
    %1 = arith.minsi %0, %c0_i32 : i32
    %c0_i32_0 = arith.constant 0 : i32
    %c0_i32_1 = arith.constant 0 : i32
    return %arg0, %1, %c0_i32_0 : i32, i32, i32
  }
  func.func @transform_3(%arg0: i32, %arg1: i32) -> (i32, i32) {
    %c0_i32 = arith.constant 0 : i32
    %c0_i32_0 = arith.constant 0 : i32
    %c0_i32_1 = arith.constant 0 : i32
    return %c0_i32, %c0_i32_0 : i32, i32
  }
  func.func @transform_4(%arg0: i32, %arg1: i32) -> (i32, i32) {
    %c0_i32 = arith.constant 0 : i32
    %c0_i32_0 = arith.constant 0 : i32
    %c0_i32_1 = arith.constant 0 : i32
    return %c0_i32, %c0_i32_0 : i32, i32
  }
  func.func @transform_5(%arg0: i32, %arg1: i32) -> (i32, i32) {
    %c0_i32 = arith.constant 0 : i32
    %c0_i32_0 = arith.constant 0 : i32
    %c0_i32_1 = arith.constant 0 : i32
    return %c0_i32, %c0_i32_0 : i32, i32
  }
  func.func @transform_6(%arg0: i32, %arg1: i32) -> (i32, i32) {
    %c0_i32 = arith.constant 0 : i32
    %c0_i32_0 = arith.constant 0 : i32
    %c0_i32_1 = arith.constant 0 : i32
    return %c0_i32, %c0_i32_0 : i32, i32
  }
  func.func @transform_7(%arg0: i32, %arg1: i32) -> (i32, i32, i32) {
    %c0_i32 = arith.constant 0 : i32
    %c0_i32_0 = arith.constant 0 : i32
    return %arg0, %arg1, %c0_i32 : i32, i32, i32
  }
  func.func @transform_8(%arg0: i32, %arg1: i32) -> (i32, i32, i32, i32) {
    %c0_i32 = arith.constant 0 : i32
    %c0_i32_0 = arith.constant 0 : i32
    %c0_i32_1 = arith.constant 0 : i32
    return %arg0, %c0_i32, %arg1, %c0_i32_0 : i32, i32, i32, i32
  }
  func.func @transform_9(%arg0: i32, %arg1: i32) -> (i32, i32, i32, i32) {
    %c0_i32 = arith.constant 0 : i32
    %c0_i32_0 = arith.constant 0 : i32
    %c0_i32_1 = arith.constant 0 : i32
    return %arg0, %c0_i32, %arg1, %c0_i32_0 : i32, i32, i32, i32
  }
  func.func @transform_10(%arg0: i32, %arg1: i32) -> (i32, i32, i32, i32) {
    %c0_i32 = arith.constant 0 : i32
    %c0_i32_0 = arith.constant 0 : i32
    %c0_i32_1 = arith.constant 0 : i32
    return %arg0, %c0_i32, %arg1, %c0_i32_0 : i32, i32, i32, i32
  }
}

</mosaic_0001>

<bundles_post_ra>
// kernel: tpu_custom_call.1
= control target key start
LH: loop header
LB: loop body
LE: loop exit
PB: predicated region body
PF: predicated region fallthrough
CT: control target
= control target key end

     0   :  { %6 = vsyncpa [#allocation3], 0  ;;  %s305_s0 = inlined_call_operand.hbm [shape: f32[8,128], index: 0, kind: input, shape index: {}]   ;;  %s306_s1 = inlined_call_operand.hbm [shape: f32[8,128], index: 1, kind: output, shape index: {}]  }
   0x1   :  { %7 = vsyncpa [#allocation4], 0  ;;  %s258_s6 = smov 0  }
   0x2 LB: > { %s145_s7 = sadd.s32 4294967295, %s244_s6   ;;  %p146_p0 = scmp.ge.s32.totalorder %s244_s6, 1  ;;  %s244_s6 = sphi %s258_s6, %s13_s6  }
   0x3   : > { %p60_p1 = scmp.lt.s32.totalorder %s244_s6, 3  ;;  %p270_p3 = scmp.eq.s32.totalorder %s145_s7, 0 }
   0x4   : > { %s246_s10 = smov [#allocation2]  }
   0x5   : > { %p266_p2 = pnand %p146_p0, %p60_p1  ;;  %s73_s11 = sshll.u32 %s246_s10, 4  ;;  %s74_s11 = int_to_ptr.vmem [resolvable:$true] %s73_s11 }
   0x6   : > { %s191_s12 = scalar_lea.vmem %s74_s11, 128  ;;  %p199_p10 = scmp.lt.s32.totalorder %s74_s11, %s74_s11 }
   0x7   : > { %p162_p4 = pneg %p266_p2  ;;  %p192_p7 = scmp.ne.s32.totalorder %s74_s11, %s191_s12 }
   0x8   : > { %p200_p11 = scmp.lt.s32.totalorder %s191_s12, %s191_s12 }
   0x9   : > { %p163_p5 = pnand %p270_p3, %p162_p4 }
   0xa   : > { %p201_p12 = por %p200_p11, %p199_p10 }
   0xb   : > { %p182_p6 = pneg %p163_p5 }
   0xd   : > { %p194_p8 = pnand %p192_p7, %p182_p6 }
   0xf   : > { %p195_p9 = pneg %p194_p8 }
  0x11   : > { %p202_p13 = pnand %p201_p12, %p195_p9 }
  0x13   : > { %205 = shalt.err (!%p202_p13)
}
  0x14   : > { %165 = dma.hbm_to_vmem [thread:$0]  (!%p163_p5), %s305_s0, 128, %s74_s11, [#allocation3]  }
  0x15   : > { %86 = sbr.rel (%p266_p2) target bundleno = 42 (0x2a), region = 24 }
  0x1a   : > { %235 = dma.done.wait (%p270_p3), [#allocation3], 128  }
  0x1b   : > { %237 = vsyncadd (%p270_p3), [#allocation3], 4294967168  ;;  %s247_s15 = smov [#allocation5]   ;;  %v96_v0 = vld [vmem:[#allocation2] sm:$0xff]  ;;  %p287_p0 = scmp.eq.s32.totalorder %s145_s7, 1 }
  0x1c   : > { %s106_s16 = sshll.u32 %s247_s15, 4  ;;  %v97_v1 = vadd.f32 1.0, %v96_v0  ;;  %s107_s16 = int_to_ptr.vmem [resolvable:$true] %s106_s16 }
  0x1d   : > { %s206_s18 = scalar_lea.vmem %s107_s16, 128  ;;  %p213_p5 = scmp.lt.s32.totalorder %s107_s16, %s107_s16 }
  0x1e   : > { %98 = vst [vmem:[#allocation5] sm:$0xff] %v97_v1  ;;  %p207_p1 = scmp.ne.s32.totalorder %s107_s16, %s206_s18  ;;  %p214_p6 = scmp.lt.s32.totalorder %s206_s18, %s206_s18 }
  0x20   : > { %p208_p2 = pnand %p207_p1, %p287_p0  ;;  %p215_p7 = por %p214_p6, %p213_p5 }
  0x22   : > { %p209_p4 = pneg %p208_p2 }
  0x24   : > { %p216_p3 = pnand %p215_p7, %p209_p4 }
  0x26   : > { %219 = shalt.err (!%p216_p3)
}
  0x27   : > { %159 = dma.vmem_to_hbm [thread:$0]  (%p287_p0), %s107_s16, 128, %s306_s1, [#allocation4]  }
  0x28   : > { %239 = dma.done.wait (%p287_p0), [#allocation4], 128  }
  0x29   : > { %241 = vsyncadd (%p287_p0), [#allocation4], 4294967168 }
  0x2a PF: > { %s13_s6 = sadd.s32 1, %s244_s6  }
  0x2b   : > { %p10_p8 = scmp.ge.s32.totalorder %s13_s6, 4  }
  0x2d   :  { %12 = sbr.rel (!%p10_p8) target bundleno = 2 (0x2), region = 53 }
  0x32   :  { %119 = vsyncpa [#allocation3], 1 }
  0x33   :  { %121 = vsyncpa [#allocation3 + $0x1], 1 }
  0x34   :  { %122 = vsyncpa [#allocation4], 1 }
  0x35   :  { %124 = vsyncpa [#allocation4 + $0x1], 1 }

// kernel: tpu_custom_call.1
= control target key start
LH: loop header
LB: loop body
LE: loop exit
PB: predicated region body
PF: predicated region fallthrough
CT: control target
= control target key end

     0   :  { %s2328_s0 = inlined_call_operand.hbm [shape: bf16[2,8,16], index: 0, kind: input, shape index: {}]   ;;  %s2329_s1 = inlined_call_operand.hbm [shape: bf16[2,8,16], index: 1, kind: input, shape index: {}]   ;;  %s2330_s2 = inlined_call_operand.hbm [shape: bf16[2,8,16], index: 2, kind: input, shape index: {}]   ;;  %s2331_s3 = inlined_call_operand.hbm [shape: bf16[16,96], index: 3, kind: input, shape index: {}]   ;;  %s2332_s4 = inlined_call_operand.hbm [shape: f32[4,32], index: 4, kind: input, shape index: {}]   ;;  %s2333_s5 = inlined_call_operand.vmem [shape: bf16[16,32], index: 5, kind: input, shape index: {}]   ;;  %s2334_s6 = inlined_call_operand.hbm [shape: bf16[32,96], index: 6, kind: input, shape index: {}]   ;;  %s2335_s7 = inlined_call_operand.hbm [shape: bf16[2,8,32], index: 7, kind: output, shape index: {0}]   ;;  %s2336_s8 = inlined_call_operand.vmem [shape: bf16[2,8,8,4], index: 8, kind: output, shape index: {1}]   ;;  %s2337_s9 = inlined_call_operand.vmem [shape: bf16[2,8,8,4], index: 9, kind: output, shape index: {2}]   ;;  %s2338_s10 = inlined_call_operand.vmem [shape: bf16[2,8,8,4], index: 10, kind: output, shape index: {3}]  }
   0x1   :  { %2354 = sst [smem:[#allocation25_spill]] %s2329_s1 }
   0x2   :  { %2355 = sst [smem:[#allocation26_spill]] %s2331_s3 }
   0x3   :  { %2356 = sst [smem:[#allocation27_spill]] %s2332_s4 }
   0x4   :  { %2357 = sst [smem:[#allocation28_spill]] %s2337_s9 }
   0x5   :  { %2358 = sst [smem:[#allocation29_spill]] %s2338_s10 }
   0x6   :  { %16 = vsyncpa [#allocation3], 0 }
   0x7   :  { %18 = vsyncpa [#allocation3 + $0x1], 0 }
   0x8   :  { %19 = vsyncpa [#allocation6], 0 }
   0x9   :  { %21 = vsyncpa [#allocation6 + $0x1], 0 }
   0xa   :  { %22 = vsyncpa [#allocation9], 0 }
   0xb   :  { %23 = vsyncpa [#allocation12], 0 }
   0xc   :  { %24 = vsyncpa [#allocation4], 0 }
   0xd   :  { %26 = vsyncpa [#allocation4 + $0x1], 0  ;;  %s1970_s13 = smov 0   ;;  %s1972_s14 = smov 0  }
   0xe   :  { %s1974_s15 = smov 0   ;;  %s1976_s16 = smov 0  }
   0xf   :  { %s1978_s17 = smov 0   ;;  %s1980_s18 = smov 0  }
  0x10 LB: > { %2359 = sst [smem:[#allocation19_spill]] %s1858_s13  ;;  %s2001_s19 = sadd.s32 4294967295, %s1878_s18   ;;  %s1878_s18 = sphi %s1980_s18, %s32_s18   ;;  %s1874_s17 = sphi %s1978_s17, %s2398_s17   ;;  %s1870_s16 = sphi %s1976_s16, %s2397_s16   ;;  %s1866_s15 = sphi %s1974_s15, %s2401_s15   ;;  %s1862_s14 = sphi %s1972_s14, %s2400_s14   ;;  %s1858_s13 = sphi %s1970_s13, %s2399_s13  }
  0x11   : > { %2360 = sst [smem:[#allocation20_spill]] %s1874_s17  ;;  %s1371_s20 = sadd.s32 4294967294, %s1878_s18  }
  0x12   : > { %2361 = sst [smem:[#allocation21_spill]] %s1878_s18  ;;  %p66_p0 = scmp.ne.s32.totalorder %s1862_s14, %s1858_s13 }
  0x13   : > { %p2348_p1 = scmp.eq.s32.totalorder %s2001_s19, 0  ;;  %p250_p3 = scmp.eq.s32.totalorder %s1371_s20, 1 }
  0x14   : > { %p1372_p5 = scmp.ge.s32.totalorder %s1878_s18, 1  ;;  %p341_p7 = scmp.lt.s32.totalorder %s1878_s18, 3 }
  0x15   : > { %p2010_p4 = por %p2348_p1, %p66_p0  ;;  %p2015_p6 = por %p250_p3, %p66_p0 }
  0x16   : > { %p2020_p8 = pnand %p1372_p5, %p341_p7  ;;  %s1880_s24 = smov [#allocation8]  }
  0x17   : > { %s2362_s21 = scalar_select %p2010_p4, 1, 0 }
  0x18   : > { %s2363_s22 = scalar_select %p2015_p6, 1, 0 }
  0x19   : > { %s2365_s23 = scalar_select %p2020_p8, 1, 0 }
  0x1a   : > { %2364 = sst [smem:[#allocation22_spill]] %s2363_s22  ;;  %s353_s25 = sshll.u32 %s1880_s24, 4  ;;  %s354_s25 = int_to_ptr.vmem [resolvable:$true] %s353_s25 }
  0x1b   : > { %p1508_p9 = pneg %p2020_p8  ;;  %s44_s27 = sadd.s32 1, %s1874_s17 }
  0x1c   : > { %s1635_s28 = scalar_lea.vmem %s354_s25, 128  ;;  %p1643_p5 = scmp.lt.s32.totalorder %s354_s25, %s354_s25 }
  0x1d   : > { %p2029_p11 = pnand %p1508_p9, %p2348_p1  ;;  %p1636_p13 = scmp.ne.s32.totalorder %s354_s25, %s1635_s28 }
  0x1e   : > { %p1644_p7 = scmp.lt.s32.totalorder %s1635_s28, %s1635_s28 }
  0x1f   : > { %p2349_p12 = pneg %p2029_p11 }
  0x20   : > { %p1645_p2 = por %p1644_p7, %p1643_p5 }
  0x21   : > { %p1638_p0 = pnand %p1636_p13, %p2349_p12 }
  0x23   : > { %p1639_p3 = pneg %p1638_p0 }
  0x25   : > { %p1646_p10 = pnand %p1645_p2, %p1639_p3 }
  0x27   : > { %1649 = shalt.err (!%p1646_p10)
}
  0x28   : > { %s2340_s29 = smov 64   ;;  %s2341_s30 = smov 4  }
  0x29   : > { %s2367_s3 = sld [smem:[#allocation26_spill]]  ;;  %p46_p2 = scmp.ge.s32.totalorder %s44_s27, 2 }
  0x2a   : > { %s53_s20 = sadd.s32 1, %s1866_s15  ;;  %p60_p9 = scmp.ne.s32.totalorder %s1866_s15, %s1862_s14 }
  0x2b   : > { %p61_p10 = scmp.eq.s32.totalorder %s1878_s18, 0  ;;  %s2403_s27 = smov (%p46_p2, %s44_s27), 0 }
  0x2c   : > { %2368 = sst [smem:[#allocation23_spill]] %s2403_s27  ;;  %p2369_p0 = scmp.eq.s32.totalorder %s2001_s19, 1 }
  0x2d   : > { %p62_p13 = por %p61_p10, %p60_p9  ;;  %s48_s28 = ssub.s32 %s1874_s17, %s2403_s27 }
  0x2e   : > { %p2055_p3 = por %p2369_p0, %p60_p9  ;;  %p1535_p5 = scmp.lt.s32.totalorder %s1878_s18, 2 }
  0x2f   : > { %1511 = dma.hbm_to_vmem [thread:$0]  (!%p2029_p11), %s2367_s3, 128, %s354_s25, [#allocation9], %s2340_s29, %s2340_s29, %s2341_s30  }
  0x30   : > { %s2370_s24 = scalar_select %p2055_p3, 1, 0 }
  0x31   : > { %p51_p7 = scmp.eq.s32.totalorder %s48_s28, 0  ;;  %s2344_s22 = sand.u32 1, %s1866_s15  }
  0x32   : > { %s2065_s25 = sshll.u32 %s2344_s22, 2  ;;  %s2068_s11 = sshll.u32 %s1874_s17, 6 }
  0x33   : > { %s2071_s12 = scalar_select %p51_p7, %s1866_s15, %s53_s20  }
  0x34   : > { %p2073_p2 = pnand %p1535_p5, %p62_p13  ;;  %s413_s30 = sand.u32 1, %s1878_s18  }
  0x35   : > { %2371 = sst [smem:[#allocation24_spill]] %s2071_s12  ;;  %s417_s13 = scalar_lea.vmem [#allocation5], %s2065_s25 }
  0x36   : > { %s2373_s1 = sld [smem:[#allocation25_spill]]  ;;  %s428_s22 = sshll.u32 %s417_s13, 4  ;;  %s429_s22 = int_to_ptr.vmem [resolvable:$true] %s428_s22 }
  0x37   : > { %s1883_s9 = smov [#allocation10]   ;;  %s2083_s10 = scalar_lea.sflag [#allocation6], %s413_s30 }
  0x38   : > { %s367_s17 = sshll.u32 %s1883_s9, 4  ;;  %p2350_p9 = pneg %p2073_p2  ;;  %s368_s17 = int_to_ptr.vmem [resolvable:$true] %s367_s17 }
  0x39   : > { %s1663_s20 = scalar_lea.vmem %s429_s22, 64  ;;  %s1884_s12 = smov [#allocation5]  }
  0x3a   : > { %p1664_p10 = scmp.ne.s32.totalorder %s429_s22, %s1663_s20  ;;  %s1668_s18 = sshll.u32 %s1884_s12, 4  ;;  %s1669_s18 = int_to_ptr.vmem [resolvable:$false] %s1668_s18 }
  0x3b   : > { %s1670_s3 = scalar_lea.vmem %s1669_s18, 128  ;;  %p1671_p5 = scmp.lt.s32.totalorder %s429_s22, %s1669_s18 }
  0x3c   : > { %s426_s28 = scalar_lea.hbm %s2373_s1, %s2068_s11  ;;  %p1666_p13 = pnand %p1664_p10, %p2350_p9 }
  0x3d   : > { %p1672_p7 = scmp.lt.s32.totalorder %s1670_s3, %s1663_s20 }
  0x3e   : > { %p1667_p0 = pneg %p1666_p13 }
  0x3f   : > { %p1673_p1 = por %p1672_p7, %p1671_p5 }
  0x41   : > { %p1674_p12 = pnand %p1673_p1, %p1667_p0 }
  0x43   : > { %1677 = shalt.err (!%p1674_p12)
}
  0x44   : > { %1524 = dma.hbm_to_vmem [thread:$0]  (!%p2073_p2), %s426_s28, 64, %s429_s22, %s2083_s10  }
  0x45   : > { %s1689_s9 = scalar_lea.vmem %s368_s17, 64  ;;  %p2374_p10 = pneg %p2029_p11 }
  0x46   : > { %p1690_p6 = scmp.ne.s32.totalorder %s368_s17, %s1689_s9  ;;  %p1697_p3 = scmp.lt.s32.totalorder %s368_s17, %s368_s17 }
  0x47   : > { %p1698_p4 = scmp.lt.s32.totalorder %s1689_s9, %s1689_s9 }
  0x48   : > { %p1692_p13 = pnand %p1690_p6, %p2374_p10 }
  0x49   : > { %p1699_p8 = por %p1698_p4, %p1697_p3 }
  0x4a   : > { %p1693_p9 = pneg %p1692_p13 }
  0x4c   : > { %p1700_p5 = pnand %p1699_p8, %p1693_p9 }
  0x4e   : > { %1703 = shalt.err (!%p1700_p5)
}
  0x4f   : > { %s2375_s4 = sld [smem:[#allocation27_spill]]  ;;  %s1885_s22 = smov [#allocation11]  }
  0x50   : > { %s380_s27 = sshll.u32 %s1885_s22, 4  ;;  %p2376_p6 = pmov %p2374_p10  ;;  %s381_s27 = int_to_ptr.vmem [resolvable:$true] %s380_s27 }
  0x51   : > { %s1715_s30 = scalar_lea.vmem %s381_s27, 256  ;;  %p1723_p7 = scmp.lt.s32.totalorder %s381_s27, %s381_s27 }
  0x52   : > { %p1716_p1 = scmp.ne.s32.totalorder %s381_s27, %s1715_s30  ;;  %p1724_p4 = scmp.lt.s32.totalorder %s1715_s30, %s1715_s30 }
  0x54   : > { %p1718_p12 = pnand %p1716_p1, %p2376_p6  ;;  %p1725_p8 = por %p1724_p4, %p1723_p7 }
  0x55   : > { %1514 = dma.hbm_to_vmem [thread:$0]  (!%p2029_p11), %s2375_s4, 64, %s368_s17, [#allocation9]  }
  0x56   : > { %p1719_p0 = pneg %p1718_p12 }
  0x58   : > { %p1726_p3 = pnand %p1725_p8, %p1719_p0 }
  0x5a   : > { %1729 = shalt.err (!%p1726_p3)
}
  0x5b   : > { %s2377_s12 = smov 4   ;;  %s2378_s28 = smov 64  }
  0x5c   : > { %1517 = dma.hbm_to_vmem [thread:$0]  (!%p2029_p11), %s2334_s6, 256, %s381_s27, [#allocation12], %s2378_s28, %s2378_s28, %s2377_s12  }
  0x5d   : > { %s404_s13 = scalar_lea.hbm %s2328_s0, %s2068_s11  ;;  %s398_s18 = scalar_lea.vmem [#allocation2], %s2065_s25 }
  0x5e   : > { %s406_s22 = sshll.u32 %s398_s18, 4  ;;  %s2379_s30 = sand.u32 1, %s1866_s15   ;;  %s407_s22 = int_to_ptr.vmem [resolvable:$true] %s406_s22 }
  0x5f   : > { %s395_s26 = scalar_lea.sflag [#allocation3], %s2379_s30  ;;  %s1743_s1 = scalar_lea.vmem %s407_s22, 64 }
  0x60   : > { %p1744_p9 = scmp.ne.s32.totalorder %s407_s22, %s1743_s1  ;;  %p2380_p10 = pneg %p2073_p2 }
  0x61   : > { %s1886_s17 = smov [#allocation2]  }
  0x62   : > { %p1746_p13 = pnand %p1744_p9, %p2380_p10  ;;  %s1748_s20 = sshll.u32 %s1886_s17, 4  ;;  %s1749_s20 = int_to_ptr.vmem [resolvable:$false] %s1748_s20 }
  0x63   : > { %s1750_s4 = scalar_lea.vmem %s1749_s20, 128  ;;  %p1751_p11 = scmp.lt.s32.totalorder %s407_s22, %s1749_s20 }
  0x64   : > { %p1747_p5 = pneg %p1746_p13  ;;  %p1752_p1 = scmp.lt.s32.totalorder %s1750_s4, %s1743_s1 }
  0x66   : > { %p1753_p6 = por %p1752_p1, %p1751_p11 }
  0x68   : > { %p1754_p12 = pnand %p1753_p6, %p1747_p5 }
  0x6a   : > { %1757 = shalt.err (!%p1754_p12)
}
  0x6b   : > { %1521 = dma.hbm_to_vmem [thread:$0]  (!%p2073_p2), %s404_s13, 64, %s407_s22, %s395_s26  }
  0x6c   : > { %s448_s28 = scalar_lea.hbm %s2330_s2, %s2068_s11  ;;  %s439_s3 = scalar_lea.vmem [#allocation7], %s2065_s25 }
  0x6d   : > { %s450_s9 = sshll.u32 %s439_s3, 4  ;;  %p2381_p7 = pmov %p2380_p10  ;;  %s451_s9 = int_to_ptr.vmem [resolvable:$true] %s450_s9 }
  0x6e   : > { %s1771_s18 = scalar_lea.vmem %s451_s9, 64  ;;  %s1887_s1 = smov [#allocation7]  }
  0x6f   : > { %p1772_p0 = scmp.ne.s32.totalorder %s451_s9, %s1771_s18  ;;  %s1776_s4 = sshll.u32 %s1887_s1, 4  ;;  %s1777_s4 = int_to_ptr.vmem [resolvable:$false] %s1776_s4 }
  0x70   : > { %s1778_s30 = scalar_lea.vmem %s1777_s4, 128  ;;  %p1779_p3 = scmp.lt.s32.totalorder %s451_s9, %s1777_s4 }
  0x71   : > { %p1774_p4 = pnand %p1772_p0, %p2381_p7  ;;  %p1780_p9 = scmp.lt.s32.totalorder %s1778_s30, %s1771_s18 }
  0x73   : > { %p1775_p8 = pneg %p1774_p4  ;;  %p1781_p10 = por %p1780_p9, %p1779_p3 }
  0x75   : > { %p1782_p13 = pnand %p1781_p10, %p1775_p8 }
  0x77   : > { %1785 = shalt.err (!%p1782_p13)
}
  0x78   : > { %1527 = dma.hbm_to_vmem [thread:$0]  (!%p2073_p2), %s448_s28, 64, %s451_s9, %s2083_s10  }
  0x79   : > { %p2382_p5 = scmp.ne.s32.totalorder %s2365_s23, 0 }
  0x7a   : > { %s2138_s25 = sand.u32 (!%p2382_p5), 1, %s1862_s14   ;;  %p2383_p11 = scmp.ne.s32.totalorder (!%p2382_p5), %s2362_s21, 0 }
  0x7b   : > { %459 = sbr.rel (%p2382_p5) target bundleno = 1063 (0x427), region = 48  ;;  %s2141_s11 = sshll.u32 (!%p2382_p5), %s2138_s25, 2 }
  0x7c   : > { %s462_s13 = scalar_lea.sflag (!%p2382_p5), [#allocation3], %s2138_s25  ;;  %s465_s22 = scalar_lea.vmem (!%p2382_p5), [#allocation2], %s2141_s11 }
  0x80   : > { %1837 = dma.done.wait (%p2383_p11), %s462_s13, 64  }
  0x81   : > { %1839 = vsyncadd (%p2383_p11), %s462_s13, 4294967232  ;;  %s470_s10 = sand.u32 1, %s2001_s19   ;;  %s474_s29 = scalar_lea.vmem [#allocation5], %s2141_s11 }
  0x82   : > { %s471_s23 = scalar_lea.sflag [#allocation6], %s470_s10 }
  0x83   : > { %1841 = dma.done.wait (%p2383_p11), %s471_s23, 128  }
  0x84   : > { %1843 = vsyncadd (%p2383_p11), %s471_s23, 4294967168  ;;  %s483_s26 = scalar_lea.vmem [#allocation7], %s2141_s11  ;;  %p2384_p2 = scmp.eq.s32.totalorder %s2001_s19, 0 }
  0x86   : > { %1845 = dma.done.wait (%p2384_p2), [#allocation9], 192   ;;  %p2385_p1 = pmov %p2384_p2 }
  0x88   : > { %1847 = vsyncadd (%p2385_p1), [#allocation9], 4294967104  ;;  %p2386_p6 = pmov %p2385_p1 }
  0x89   : > { %p2387_p12 = pmov %p2385_p1 }
  0x8a   : > { %1849 = dma.done.wait (%p2386_p6), [#allocation12], 256  }
  0x8b   : > { %1851 = vsyncadd (%p2387_p12), [#allocation12], 4294967040  ;;  %v1888_v0 = vmov 0.0   ;;  %vm1889_vm0 = vmmov 0   ;;  %v1619_v1 = vld [vmem:[#allocation8] sm:$0xff]   ;;  %vm606_vm1 = vcmask 130048   ;;  %v755_v8 = vlaneseq }
  0x8c   : > { %1456 = vmatprep.subr.bf16.mxu0 %v1888_v0  ;;  %1462 = vmatprep.subr.bf16.mxu1 %v1888_v0  ;;  %v597_v2 = vld [vmem:[%s465_s22] sm:$0xf]  ;;  %v1620_v3 = vld [vmem:[%s474_s29] ss:$0 sps:$4 sm:$0x88]   ;;  %s1890_s17 = smov 96  }
  0x8d   : > { %1458 = vmatprep.mubr.msk.bf16.mxu0 %vm1889_vm0, %v1888_v0  ;;  %1464 = vmatprep.mubr.msk.bf16.mxu1 %vm1889_vm0, %v1888_v0  ;;  %v655_v4 = vshrl.u32 %v1620_v3, 16  ;;  %v701_v6 = vld [vmem:[%s483_s26] sm:$0x1]  ;;  %v1621_v7 = vld [vmem:[%s2333_s5] sm:$0xff]   ;;  %v756_v9 = vshrl.u32 %v755_v8, 7  ;;  %s1891_s20 = smov 64  }
  0x8e   : > { %1457 = vmatpush3.bf16.msra.mxu0 %v1619_v1  ;;  %1463 = vmatpush3.bf16.msra.mxu1 %v1619_v1  ;;  %v1622_v33 = vld [vmem:[#allocation11 + $0x8] sm:$0xff]   ;;  %v1623_v35 = vld [vmem:[#allocation11] sm:$0xff]   ;;  %v1409_v37 = vld [vmem:[#allocation10 + $0x2] ss:$0 sm:$0xff]  ;;  %s1892_s27 = smov 32   ;;  %vm863_vm4 = vcmask 261120  }
  0x8f   : > { %1468 = vmatprep.subr.bf16.mxu0 %v1888_v0  ;;  %1474 = vmatprep.subr.bf16.mxu1 %v1888_v0  ;;  %v657_v5 = vrot.slane %v655_v4, 3  ;;  %v761_v11 = vsub.s32 0, %v756_v9  ;;  %vm757_vm2 = vcmp.eq.s32.totalorder %v756_v9, 0  ;;  %vm764_vm3 = vcmp.eq.s32.totalorder %v756_v9, 7  ;;  %v1410_v40 = vld [vmem:[#allocation10 + $0x3] ss:$0 sm:$0xff] }
  0x90   : > { %v1402_v43 = vld [vmem:[#allocation10] ss:$0 sm:$0xff]  ;;  %vm845_vm5 = vcmask 257024   ;;  %s535_s12 = scalar_lea.vmem [#allocation13], %s2141_s11  ;;  %p572_p0 = scmp.lt.s32.totalorder %s1870_s16, 1  ;;  %vm934_vm6 = vcmask 27648  }
  0x91   : > { %1459 = vmatmul.mubr.msk.bf16.vlgmr.msra.gmra.mxu0 %vm606_vm1, %v597_v2  ;;  %1465 = vmatmul.mubr.msk.bf16.vlgmr.msra.gmra.mxu1 %vm606_vm1, %v657_v5  ;;  %v1408_v52 = vld [vmem:[#allocation10 + $0x1] ss:$0 sm:$0xff]  ;;  %s1893_s4 = smov 92   ;;  %s1894_s30 = smov 124  }
  0x92   : > { %1469 = vmatpush3.bf16.msra.mxu0 %v1619_v1  ;;  %1470 = vmatprep.mubr.msk.bf16.mxu0 %vm1889_vm0, %v1888_v0  ;;  %s573_s28 = scalar_select %p572_p0, %s1870_s16, 1 }
  0x93   : > { %1480 = vmatprep.subr.bf16.mxu0 %v1888_v0  ;;  %1476 = vmatprep.mubr.msk.bf16.mxu1 %vm1889_vm0, %v1888_v0  ;;  %s1895_s13 = smov 120   ;;  %s1896_s22 = smov 60  }
  0x94   : > { %1475 = vmatpush3.bf16.msra.mxu1 %v1621_v7  ;;  %s2186_s3 = sshll.u32 %s573_s28, 5  ;;  %s1897_s10 = smov 56  }
  0x95   : > { %s2192_s1 = scalar_lea.vmem %s2336_s8, %s2186_s3  ;;  %s1898_s23 = smov 88  }
  0x96   : > { %s1899_s29 = smov 84   ;;  %s1900_s26 = smov 116  }
  0x97   : > { %s1901_s19 = smov 112   ;;  %s1902_s21 = smov 52  }
  0x98   : > { %s1906_s28 = smov 108   ;;  %s1436_s9 = sshll.u32 %s1870_s16, 6 }
  0x99   : > { %1471 = vmatmul.mubr.msk.bf16.vlgmr.msra.gmra.mxu0 %vm606_vm1, %v701_v6  ;;  %1477 = vmatmul.mubr.msk.bf16.vlgmr.msra.gmra.mxu1 %vm606_vm1, %v597_v2  ;;  %s1907_s18 = smov 104   ;;  %p2388_p4 = scmp.ne.s32.totalorder %s2370_s24, 0 }
  0x9a   : > { %1484 = vmatprep.mubr.msk.bf16.mxu0 %vm1889_vm0, %v1888_v0  ;;  %1481 = vmatpush3.bf16.msra.mxu0 %v1622_v33  ;;  %s1909_s16 = smov [#allocation13]  }
  0x9b   : > { %1482 = vmatprep.subr.bf16.mxu0 %v1888_v0 }
  0x9e   : > { %1483 = vmatpush3.bf16.msra.mxu0 %v1623_v35 }
 0x151   : > { %v644_v10 = vpop.f32.mrf.mxu0  ;;  %v695_v13 = vpop.f32.mrf.mxu1 }
 0x152   : > { %779 = vrot.lane.b32.xlu1 %v644_v10, %s1890_s17  ;;  %766 = vrot.lane.b32.xlu0 %v644_v10, %s1891_s20  ;;  %v749_v14 = vmul.f32 0.0, %v695_v13  ;;  %v758_v17 = vrot.slane %v644_v10, 7 }
 0x153   : > { %v1460_v12 = vpop.f32.mrf.mxu0  ;;  %v1466_v16 = vpop.f32.mrf.mxu1 }
 0x154   : > { %v762_v18 = vrot.slane %v749_v14, %v761_v11 }
 0x155   : > { %v647_v15 = vpop.f32.mrf.mxu0  ;;  %v698_v20 = vpop.f32.mrf.mxu1 }
 0x156   : > { %v763_v21 = vsel %vm757_vm2, %v762_v18, %v758_v17 }
 0x157   : > { %v1461_v19 = vpop.f32.mrf.mxu0  ;;  %v1467_v22 = vpop.f32.mrf.mxu1 }
 0x159   : > { %v739_v23 = vpop.f32.mrf.mxu0  ;;  %v837_v29 = vpop.f32.mrf.mxu1 }
 0x15a   : > { %v754_v34 = vmul.f32 0.0, %v739_v23 }
 0x15b   : > { %v1472_v24 = vpop.f32.mrf.mxu0  ;;  %v1478_v30 = vpop.f32.mrf.mxu1 }
 0x15c   : > { %v773_v36 = vrot.slane %v754_v34, %v761_v11 }
 0x15d   : > { %v742_v25 = vpop.f32.mrf.mxu0  ;;  %v840_v31 = vpop.f32.mrf.mxu1 }
 0x15f   : > { %v1473_v26 = vpop.f32.mrf.mxu0  ;;  %v1479_v32 = vpop.f32.mrf.mxu1 }
 0x1c4   : > { %v767_v27 = vpop.permute.xlu0 %766  ;;  %v780_v41 = vpop.permute.xlu1 %779 }
 0x1c5   : > { %v769_v28 = vrot.slane %v767_v27, 1  ;;  %v782_v42 = vadd.f32 %v780_v41, %v763_v21 }
 0x1c7   : > { %775 = vrot.lane.b32.xlu0 %v769_v28, %s1891_s20 }
 0x1cb   : > { %919 = vrot.lane.b32.xlu0 %v1409_v37, %s1892_s27  ;;  %s1905_s27 = smov 76  }
 0x239   : > { %v776_v38 = vpop.permute.xlu0 %775 }
 0x23a   : > { %v778_v39 = vsel %vm764_vm3, %v773_v36, %v776_v38 }
 0x23b   : > { %784 = vrot.lane.b32.xlu1 %v778_v39, %s1891_s20 }
 0x23d   : > { %v920_v50 = vpop.permute.xlu0 %919 }
 0x23f   : > { %929 = vrot.lane.b32.xlu1 %v1410_v40, %s1891_s20 }
 0x2ad   : > { %v785_v44 = vpop.permute.xlu1 %784 }
 0x2ae   : > { %v787_v45 = vadd.f32 %v785_v44, %v782_v42 }
 0x2b0   : > { %v793_v46 = vadd.f32 %v1402_v43, %v787_v45 }
 0x2b1   : > { %v930_v51 = vpop.permute.xlu1 %929 }
 0x2b2   : > { %v794_v47 = vmax.f32 %v793_v46, 0.0 }
 0x2b4   : > { %v843_v48 = vadd.f32 %v837_v29, %v794_v47 }
 0x2b6   : > { %v844_v49 = vpack.c.bf16 %v843_v48, %v843_v48 }
 0x2b8   : > { %1485 = vmatmul.mubr.msk.bf16.vlgmr.msra.gmra.mxu0 %vm863_vm4, %v844_v49  ;;  %846 = vst.msk [vmem:[%s535_s12] sm:$0xf] %vm845_vm5, %v844_v49 }
 0x378   : > { %v901_v53 = vpop.f32.mrf.mxu0 }
 0x379   : > { %v912_v54 = vadd.f32 %v1408_v52, %v901_v53  ;;  %v922_v55 = vadd.f32 %v920_v50, %v901_v53  ;;  %v932_v56 = vadd.f32 %v930_v51, %v901_v53 }
 0x37a   : > { %v1486_v57 = vpop.f32.mrf.mxu0 }
 0x37b   : > { %v2194_v58 = vpack.c.bf16 %v912_v54, %v912_v54  ;;  %v2196_v59 = vpack.c.bf16 %v922_v55, %v922_v55  ;;  %v2198_v60 = vpack.c.bf16 %v932_v56, %v932_v56 }
 0x37c   : > { %v904_v61 = vpop.f32.mrf.mxu0 }
 0x37d   : > { %948 = vrot.lane.b32.xlu1 %v2198_v60, %s1891_s20  ;;  %940 = vrot.lane.b32.xlu0 %v2196_v59, %s1890_s17  ;;  %935 = vst.msk [vmem:[%s2192_s1] sm:$0xf] %vm934_vm6, %v2194_v58  ;;  %s1903_s17 = smov 48   ;;  %s1904_s20 = smov 80  }
 0x37e   : > { %v1487_v62 = vpop.f32.mrf.mxu0 }
 0x381   : > { %960 = vrot.lane.b32.xlu1 %v2196_v59, %s1893_s4  ;;  %955 = vrot.lane.b32.xlu0 %v2194_v58, %s1894_s30  ;;  %s1908_s4 = smov 44  }
 0x385   : > { %970 = vrot.lane.b32.xlu1 %v2194_v58, %s1895_s13  ;;  %965 = vrot.lane.b32.xlu0 %v2198_v60, %s1896_s22  ;;  %s1097_s22 = scalar_lea.hbm %s2335_s7, %s1436_s9 }
 0x389   : > { %980 = vrot.lane.b32.xlu1 %v2198_v60, %s1897_s10  ;;  %975 = vrot.lane.b32.xlu0 %v2196_v59, %s1898_s23  ;;  %s1099_s10 = sshll.u32 %s535_s12, 4  ;;  %s1061_s23 = scalar_lea.sflag [#allocation4], %s2138_s25  ;;  %s1100_s10 = int_to_ptr.vmem [resolvable:$true] %s1099_s10 }
 0x38d   : > { %990 = vrot.lane.b32.xlu1 %v2196_v59, %s1899_s29  ;;  %985 = vrot.lane.b32.xlu0 %v2194_v58, %s1900_s26  ;;  %s1786_s29 = scalar_lea.vmem %s1100_s10, 64  ;;  %s1790_s26 = sshll.u32 %s1909_s16, 4  ;;  %s1791_s26 = int_to_ptr.vmem [resolvable:$false] %s1790_s26 }
 0x38e   : > { %p1787_p7 = scmp.ne.s32.totalorder %s1100_s10, %s1786_s29  ;;  %p1793_p9 = scmp.lt.s32.totalorder %s1100_s10, %s1791_s26 }
 0x390   : > { %p1788_p8 = pnand %p1787_p7, %p2388_p4 }
 0x391   : > { %1000 = vrot.lane.b32.xlu1 %v2194_v58, %s1901_s19  ;;  %995 = vrot.lane.b32.xlu0 %v2198_v60, %s1902_s21  ;;  %s1792_s19 = scalar_lea.vmem %s1791_s26, 128 }
 0x392   : > { %p1789_p3 = pneg %p1788_p8  ;;  %p1794_p10 = scmp.lt.s32.totalorder %s1792_s19, %s1786_s29 }
 0x394   : > { %p1795_p13 = por %p1794_p10, %p1793_p9 }
 0x395   : > { %1010 = vrot.lane.b32.xlu1 %v2198_v60, %s1903_s17  ;;  %1005 = vrot.lane.b32.xlu0 %v2196_v59, %s1904_s20 }
 0x396   : > { %p1796_p5 = pnand %p1795_p13, %p1789_p3 }
 0x399   : > { %1020 = vrot.lane.b32.xlu1 %v2196_v59, %s1905_s27  ;;  %1015 = vrot.lane.b32.xlu0 %v2194_v58, %s1906_s28 }
 0x39d   : > { %1030 = vrot.lane.b32.xlu1 %v2194_v58, %s1907_s18  ;;  %1025 = vrot.lane.b32.xlu0 %v2198_v60, %s1908_s4 }
 0x39e   : > { %1799 = shalt.err (!%p1796_p5)
}
 0x39f   : > { %s1800_s21 = scalar_lea.hbm %s1097_s22, 64  ;;  %s1804_s12 = scalar_lea.hbm %s2335_s7, 128 }
 0x3a0   : > { %p1801_p11 = scmp.ne.s32.totalorder %s1097_s22, %s1800_s21  ;;  %p1805_p6 = scmp.lt.s32.totalorder %s1097_s22, %s2335_s7 }
 0x3a1   : > { %p1806_p12 = scmp.lt.s32.totalorder %s1804_s12, %s1800_s21 }
 0x3a2   : > { %p1802_p2 = pnand %p1801_p11, %p2388_p4 }
 0x3a3   : > { %p1807_p0 = por %p1806_p12, %p1805_p6 }
 0x3a4   : > { %p1803_p1 = pneg %p1802_p2 }
 0x3a6   : > { %p1808_p7 = pnand %p1807_p0, %p1803_p1 }
 0x3a8   : > { %1811 = shalt.err (!%p1808_p7)
}
 0x3a9   : > { %1506 = dma.vmem_to_hbm [thread:$0]  (%p2388_p4), %s1100_s10, 64, %s1097_s22, %s1061_s23  }
 0x3aa   : > { %s1910_s27 = smov 40   ;;  %s1911_s28 = smov 72  }
 0x3ab   : > { %1040 = vrot.lane.b32.xlu1 %v2198_v60, %s1910_s27  ;;  %1035 = vrot.lane.b32.xlu0 %v2196_v59, %s1911_s28  ;;  %s1912_s9 = smov 68   ;;  %s1913_s18 = smov 100  }
 0x3ac   : > { %s1914_s4 = smov 36   ;;  %s2389_s13 = sld [smem:[#allocation29_spill]] }
 0x3ad   : > { %s2390_s29 = sld [smem:[#allocation28_spill]] }
 0x3af   : > { %1050 = vrot.lane.b32.xlu1 %v2196_v59, %s1912_s9  ;;  %1045 = vrot.lane.b32.xlu0 %v2194_v58, %s1913_s18 }
 0x3b2   : > { %s2251_s22 = scalar_lea.vmem %s2389_s13, %s2186_s3 }
 0x3b3   : > { %1055 = vrot.lane.b32.xlu0 %v2198_v60, %s1914_s4  ;;  %s2257_s16 = scalar_lea.vmem %s2390_s29, %s2186_s3 }
 0x3ef   : > { %v949_v63 = vpop.permute.xlu1 %948  ;;  %v941_v0 = vpop.permute.xlu0 %940 }
 0x3f0   : > { %951 = vst.msk [vmem:[%s2251_s22] sm:$0xf] %vm934_vm6, %v949_v63  ;;  %943 = vst.msk [vmem:[%s2257_s16] sm:$0xf] %vm934_vm6, %v941_v0 }
 0x3f3   : > { %v961_v1 = vpop.permute.xlu1 %960  ;;  %v956_v2 = vpop.permute.xlu0 %955 }
 0x3f4   : > { %1415 = vst.msk [vmem:[%s2257_s16 + $0x4] sm:$0xf] %vm934_vm6, %v961_v1  ;;  %1414 = vst.msk [vmem:[%s2192_s1 + $0x4] sm:$0xf] %vm934_vm6, %v956_v2 }
 0x3f7   : > { %v971_v3 = vpop.permute.xlu1 %970  ;;  %v966_v4 = vpop.permute.xlu0 %965 }
 0x3f8   : > { %1417 = vst.msk [vmem:[%s2192_s1 + $0x8] sm:$0xf] %vm934_vm6, %v971_v3  ;;  %1416 = vst.msk [vmem:[%s2251_s22 + $0x4] sm:$0xf] %vm934_vm6, %v966_v4 }
 0x3fb   : > { %v981_v5 = vpop.permute.xlu1 %980  ;;  %v976_v6 = vpop.permute.xlu0 %975 }
 0x3fc   : > { %1419 = vst.msk [vmem:[%s2251_s22 + $0x8] sm:$0xf] %vm934_vm6, %v981_v5  ;;  %1418 = vst.msk [vmem:[%s2257_s16 + $0x8] sm:$0xf] %vm934_vm6, %v976_v6 }
 0x3ff   : > { %v991_v7 = vpop.permute.xlu1 %990  ;;  %v986_v8 = vpop.permute.xlu0 %985 }
 0x400   : > { %1421 = vst.msk [vmem:[%s2257_s16 + $0xc] sm:$0xf] %vm934_vm6, %v991_v7  ;;  %1420 = vst.msk [vmem:[%s2192_s1 + $0xc] sm:$0xf] %vm934_vm6, %v986_v8 }
 0x403   : > { %v1001_v9 = vpop.permute.xlu1 %1000  ;;  %v996_v10 = vpop.permute.xlu0 %995 }
 0x404   : > { %1423 = vst.msk [vmem:[%s2192_s1 + $0x10] sm:$0xf] %vm934_vm6, %v1001_v9  ;;  %1422 = vst.msk [vmem:[%s2251_s22 + $0xc] sm:$0xf] %vm934_vm6, %v996_v10 }
 0x407   : > { %v1011_v11 = vpop.permute.xlu1 %1010  ;;  %v1006_v12 = vpop.permute.xlu0 %1005 }
 0x408   : > { %1425 = vst.msk [vmem:[%s2251_s22 + $0x10] sm:$0xf] %vm934_vm6, %v1011_v11  ;;  %1424 = vst.msk [vmem:[%s2257_s16 + $0x10] sm:$0xf] %vm934_vm6, %v1006_v12 }
 0x40b   : > { %v1021_v13 = vpop.permute.xlu1 %1020  ;;  %v1016_v14 = vpop.permute.xlu0 %1015 }
 0x40c   : > { %1427 = vst.msk [vmem:[%s2257_s16 + $0x14] sm:$0xf] %vm934_vm6, %v1021_v13  ;;  %1426 = vst.msk [vmem:[%s2192_s1 + $0x14] sm:$0xf] %vm934_vm6, %v1016_v14 }
 0x40f   : > { %v1031_v15 = vpop.permute.xlu1 %1030  ;;  %v1026_v16 = vpop.permute.xlu0 %1025 }
 0x410   : > { %1429 = vst.msk [vmem:[%s2192_s1 + $0x18] sm:$0xf] %vm934_vm6, %v1031_v15  ;;  %1428 = vst.msk [vmem:[%s2251_s22 + $0x14] sm:$0xf] %vm934_vm6, %v1026_v16 }
 0x41d   : > { %v1041_v17 = vpop.permute.xlu1 %1040  ;;  %v1036_v18 = vpop.permute.xlu0 %1035 }
 0x41e   : > { %1431 = vst.msk [vmem:[%s2251_s22 + $0x18] sm:$0xf] %vm934_vm6, %v1041_v17  ;;  %1430 = vst.msk [vmem:[%s2257_s16 + $0x18] sm:$0xf] %vm934_vm6, %v1036_v18 }
 0x421   : > { %v1051_v19 = vpop.permute.xlu1 %1050  ;;  %v1046_v20 = vpop.permute.xlu0 %1045 }
 0x422   : > { %1433 = vst.msk [vmem:[%s2257_s16 + $0x1c] sm:$0xf] %vm934_vm6, %v1051_v19  ;;  %1432 = vst.msk [vmem:[%s2192_s1 + $0x1c] sm:$0xf] %vm934_vm6, %v1046_v20 }
 0x425   : > { %v1056_v21 = vpop.permute.xlu0 %1055 }
 0x426   : > { %1434 = vst.msk [vmem:[%s2251_s22 + $0x1c] sm:$0xf] %vm934_vm6, %v1056_v21 }
 0x427 PF: > { %s2391_s3 = sld [smem:[#allocation19_spill]] }
 0x428   : > { %s2392_s26 = sld [smem:[#allocation22_spill]] }
 0x429   : > { %s2393_s19 = sld [smem:[#allocation21_spill]] }
 0x42d   : > { %s1120_s21 = sand.u32 1, %s2391_s3  }
 0x42e   : > { %p2394_p4 = scmp.ne.s32.totalorder %s2392_s26, 0  ;;  %s1121_s25 = scalar_lea.sflag [#allocation4], %s1120_s21 }
 0x42f   : > { %p2395_p8 = scmp.ge.s32.totalorder %s2393_s19, 2 }
 0x431   : > { %p1529_p3 = pnand %p2395_p8, %p2394_p4 }
 0x433   : > { %p1530_p9 = pneg %p1529_p3 }
 0x435   : > { %1853 = dma.done.wait (%p1530_p9), %s1121_s25, 64  }
 0x436   : > { %1855 = vsyncadd (%p1530_p9), %s1121_s25, 4294967232  ;;  %s32_s18 = sadd.s32 1, %s2393_s19   ;;  %s2396_s1 = sld [smem:[#allocation24_spill]] }
 0x437   : > { %p29_p10 = scmp.ge.s32.totalorder %s32_s18, 4   ;;  %s2397_s16 = sld [smem:[#allocation20_spill]] }
 0x438   : > { %s2398_s17 = sld [smem:[#allocation23_spill]]  ;;  %s2399_s13 = smov %s1862_s14 }
 0x439   : > { %s2400_s14 = smov %s1866_s15  ;;  %31 = sbr.rel (!%p29_p10) target bundleno = 16 (0x10), region = 186 }
 0x43c   : > { %s2401_s15 = smov %s2396_s1 }
 0x43e   :  { %1159 = vsyncpa [#allocation3], 1 }
 0x43f   :  { %1161 = vsyncpa [#allocation3 + $0x1], 1 }
 0x440   :  { %1162 = vsyncpa [#allocation6], 1 }
 0x441   :  { %1164 = vsyncpa [#allocation6 + $0x1], 1 }
 0x442   :  { %1165 = vsyncpa [#allocation9], 1 }
 0x443   :  { %1166 = vsyncpa [#allocation12], 1 }
 0x444   :  { %1167 = vsyncpa [#allocation4], 1 }
 0x445   :  { %1169 = vsyncpa [#allocation4 + $0x1], 1 }

</bundles_post_ra>
